<compile_context>
chip_gen: v6e
topology: v6e:2x2x1
jax: 0.10.0
libtpu: 0.0.40
codegen_flags: <defaults>
</compile_context>

<pallas_src>
import functools

import jax
import jax.numpy as jnp
from jax.experimental import pallas as pl
from jax.experimental.pallas import tpu as pltpu

K = 7      # conv kernel size
PAD = 3    # "same" padding for stride 1


def _round_up(x, m):
  return ((x + m - 1) // m) * m


def _pick_chunk(hw):
  """Largest lane chunk <= 1024 that divides HW (falls back to HW)."""
  if hw <= 1024:
    return hw
  for c in (1024, 512, 256, 128):
    if hw % c == 0:
      return c
  return hw


def fused_two_conv_kernel(x2_ref, x6_ref, x5_ref,
                          w2_ref, b2_ref, w1_ref, b1_ref,
                          out_ref,
                          xv_ref, rb_ref, res_ref,
                          *, W, HW, RBW, BASE, OFF, CHUNK):
  """relu(conv2(x2)+x6) -> conv1(.)+x5 for one batch element.

  Layout: channels on sublanes, flattened spatial (H*W) on lanes.
    x2_ref/x6_ref/x5_ref/out_ref : (C, HW)
    w2_ref/w1_ref : (7*Cout, 7*Cin) stacked weights  [kw*Cout+co, kh*Cin+ci]
    b2_ref/b1_ref : (C, 1)
    xv_ref  : (C, L)        flattened input with physical vertical padding
    rb_ref  : (7*Cin, RBW)  row-expanded slab  rb[kh*Cin+ci, j] = xv[ci, BASE+kh*W+j]
    res_ref : (7*Cout, RBW) stacked matmul result
  """
  Cin = x2_ref.shape[0]
  Cout = out_ref.shape[0]
  L = xv_ref.shape[1]

  # Zero ONLY the padding regions (few KB) every grid step.  Never gate this
  # on program_id: under ("parallel",) the second TensorCore may start at n=1.
  xv_ref[:, :OFF] = jnp.zeros((Cin, OFF), jnp.float32)
  xv_ref[:, OFF + HW:] = jnp.zeros((Cin, L - OFF - HW), jnp.float32)
  # Interior <- x2 (OFF and HW are lane-aligned -> dense unmasked stores).
  xv_ref[:, OFF:OFF + HW] = x2_ref[...]

  pow2 = (W & (W - 1)) == 0

  def conv_pass(w_ref, b_ref, add_ref, relu):
    # (1) Row-expanded slab: 7 shifted copies of the padded image.
    for kh in range(K):
      s = BASE + kh * W
      rb_ref[kh * Cin:(kh + 1) * Cin, :] = xv_ref[:, s:s + RBW]

    # (2) ONE stacked MXU matmul per pass (M=7*Cout=112, K=7*Cin=112, N=RBW).
    res_ref[...] = jnp.dot(w_ref[...], rb_ref[...],
                           preferred_element_type=jnp.float32)

    # (3) Accumulate the 7 kw row-groups of the result, lane-chunked so the
    #     accumulator stays ~16 vregs; bias added via (C,1) broadcast.
    bias = b_ref[...]                                   # (Cout, 1)
    for c0 in range(0, HW, CHUNK):
      lane = jax.lax.broadcasted_iota(jnp.int32, (1, CHUNK), 1) + c0
      wcol = (lane & (W - 1)) if pow2 else (lane % W)   # w coordinate per lane
      acc = add_ref[:, c0:c0 + CHUNK] + bias            # residual + bias
      for kw in range(K):
        part = res_ref[kw * Cout:(kw + 1) * Cout, c0 + kw:c0 + kw + CHUNK]
        if kw < PAD:                                    # left-pad taps
          part = jnp.where(wcol >= PAD - kw, part, 0.0)
        elif kw > PAD:                                  # right-pad taps
          part = jnp.where(wcol < W + PAD - kw, part, 0.0)
        acc = acc + part
      if relu:
        # v3 chunk goes straight back into the padded scratch for pass 2.
        xv_ref[:, OFF + c0:OFF + c0 + CHUNK] = jnp.maximum(acc, 0.0)
      else:
        out_ref[:, c0:c0 + CHUNK] = acc.astype(out_ref.dtype)

  # v3 = relu(conv2(x2) + x6)   (stays in VMEM, written into the xv interior)
  conv_pass(w2_ref, b2_ref, x6_ref, relu=True)
  # v5 = conv1(v3) + x5
  conv_pass(w1_ref, b1_ref, x5_ref, relu=False)


def _prep_weight(w_oihw):
  """(Cout, Cin, kh, kw) -> (7*Cout, 7*Cin) stacked: [kw*Cout+co, kh*Cin+ci]."""
  cout, cin = w_oihw.shape[0], w_oihw.shape[1]
  return jnp.transpose(w_oihw, (3, 0, 2, 1)).reshape(K * cout, K * cin)


@jax.jit
def model_forward(x6, x2, x5, params):
  """Mirrors Model.forward(x6, x2, x5). Inputs/outputs are NCHW."""
  N, C, H, W = x2.shape
  HW = H * W
  # Free contiguous reshapes only (no transposes, no HBM pads).
  x2f = x2.reshape(N, C, HW)
  x6f = x6.reshape(N, C, HW)
  x5f = x5.reshape(N, C, HW)
  w2s = _prep_weight(params["w2"])
  b2 = params["b2"].reshape(C, 1)
  w1s = _prep_weight(params["w1"])
  b1 = params["b1"].reshape(C, 1)

  # Geometry of the padded / row-expanded scratch buffers (all lane-aligned).
  RBW = _round_up(HW + 2 * PAD, 128)          # row-expanded slab width
  BASE = (-(PAD * W + PAD)) % 128             # extra left pad -> OFF aligned
  OFF = BASE + PAD * W + PAD                  # interior start (mult. of 128)
  L = _round_up(BASE + (K - 1) * W + RBW, 128)
  CHUNK = _pick_chunk(HW)

  kernel = functools.partial(fused_two_conv_kernel, W=W, HW=HW, RBW=RBW,
                             BASE=BASE, OFF=OFF, CHUNK=CHUNK)

  batch_spec = pl.BlockSpec((None, C, HW), lambda n: (n, 0, 0))
  w_spec = pl.BlockSpec((K * C, K * C), lambda n: (0, 0))
  b_spec = pl.BlockSpec((C, 1), lambda n: (0, 0))

  out = pl.pallas_call(
      kernel,
      out_shape=jax.ShapeDtypeStruct((N, C, HW), x2.dtype),
      grid=(N,),
      in_specs=[
          batch_spec,          # x2
          batch_spec,          # x6
          batch_spec,          # x5
          w_spec, b_spec,      # conv2 params (stacked) + bias
          w_spec, b_spec,      # conv1 params (stacked) + bias
      ],
      out_specs=pl.BlockSpec((None, C, HW), lambda n: (n, 0, 0)),
      scratch_shapes=[
          pltpu.VMEM((C, L), jnp.float32),          # padded flattened input
          pltpu.VMEM((K * C, RBW), jnp.float32),    # row-expanded slab
          pltpu.VMEM((K * C, RBW), jnp.float32),    # stacked matmul result
      ],
      compiler_params=pltpu.CompilerParams(
          dimension_semantics=("parallel",)),
  )(x2f, x6f, x5f, w2s, b2, w1s, b1)
  return out.reshape(N, C, H, W)


def init_params(key, cin=16, cout=16):
  """Deterministic synthetic parameters (shapes match nn.Conv2d(16,16,7))."""
  k1, k2, k3, k4 = jax.random.split(key, 4)
  scale = 1.0 / jnp.sqrt(cin * K * K)
  w1 = jax.random.normal(k1, (cout, cin, K, K), jnp.float32) * scale  # OIHW
  b1 = jax.random.normal(k2, (cout,), jnp.float32) * scale
  w2 = jax.random.normal(k3, (cout, cin, K, K), jnp.float32) * scale
  b2 = jax.random.normal(k4, (cout,), jnp.float32) * scale
  # conv3 params omitted: conv3 is unused in forward().
  return {"w1": w1, "b1": b1, "w2": w2, "b2": b2}


def reference_forward(x6, x2, x5, params):
  """Pure-JAX reference (lax conv) for a correctness check."""
  def conv(x, w, b):
    y = jax.lax.conv_general_dilated(
        x, w, window_strides=(1, 1), padding=((PAD, PAD), (PAD, PAD)),
        dimension_numbers=("NCHW", "OIHW", "NCHW"))
    return y + b[None, :, None, None]

  v3 = jax.nn.relu(conv(x2, params["w2"], params["b2"]) + x6)
  return conv(v3, params["w1"], params["b1"]) + x5


if __name__ == "__main__":
  # Small shapes consistent with the module: N=2, C=16 (required by the
  # convs), spatial 16x16 (module used 64x64).
  key = jax.random.PRNGKey(0)
  kx2, kx5, kx6, kp = jax.random.split(key, 4)
  N, C, H, W = 2, 16, 16, 16
  x2 = jax.random.normal(kx2, (N, C, H, W), jnp.float32)
  x5 = jax.random.normal(kx5, (N, C, H, W), jnp.float32)
  x6 = jax.random.normal(kx6, (N, C, H, W), jnp.float32)
  params = init_params(kp, cin=C, cout=C)

  out = model_forward(x6, x2, x5, params)
  out = jax.block_until_ready(out)

  ref = reference_forward(x6, x2, x5, params)
  assert out.shape == (N, C, H, W)
  err = float(jnp.max(jnp.abs(out - ref)))
  assert err < 2e-4, f"mismatch vs reference conv: {err}"

  print("KERNEL_OK")
</pallas_src>

<mosaic_0001>
module attributes {stable_mosaic.version = 11 : i64} {
  func.func @fused_two_conv_kernel(%arg0: i32, %arg1: memref<1x16x256xf32, #tpu.memory_space<vmem>>, %arg2: memref<1x16x256xf32, #tpu.memory_space<vmem>>, %arg3: memref<1x16x256xf32, #tpu.memory_space<vmem>>, %arg4: memref<112x112xf32, #tpu.memory_space<vmem>>, %arg5: memref<16x1xf32, #tpu.memory_space<vmem>>, %arg6: memref<112x112xf32, #tpu.memory_space<vmem>>, %arg7: memref<16x1xf32, #tpu.memory_space<vmem>>, %arg8: memref<1x16x256xf32, #tpu.memory_space<vmem>>, %arg9: memref<16x640xf32, #tpu.memory_space<vmem>>, %arg10: memref<112x384xf32, #tpu.memory_space<vmem>>, %arg11: memref<112x384xf32, #tpu.memory_space<vmem>>) attributes {dimension_semantics = [#tpu.dimension_semantics<parallel>], iteration_bounds = array<i64: 2>, scalar_prefetch = 0 : i64, scratch_operands = 3 : i64, tpu.core_type = #tpu.core_type<tc>, window_params = [{transform_indices = @transform_0, window_bounds = array<i64: 1, 16, 256>}, {transform_indices = @transform_1, window_bounds = array<i64: 1, 16, 256>}, {transform_indices = @transform_2, window_bounds = array<i64: 1, 16, 256>}, {pipeline_mode = #tpu.pipeline_mode<synchronous>, transform_indices = @transform_3, window_bounds = array<i64: 112, 112>}, {pipeline_mode = #tpu.pipeline_mode<synchronous>, transform_indices = @transform_4, window_bounds = array<i64: 16, 1>}, {pipeline_mode = #tpu.pipeline_mode<synchronous>, transform_indices = @transform_5, window_bounds = array<i64: 112, 112>}, {pipeline_mode = #tpu.pipeline_mode<synchronous>, transform_indices = @transform_6, window_bounds = array<i64: 16, 1>}, {transform_indices = @transform_7, window_bounds = array<i64: 1, 16, 256>}]} {
    %cst = arith.constant 0.000000e+00 : f32
    %0 = vector.broadcast %cst : f32 to vector<16x128xf32>
    %c0 = arith.constant 0 : index
    %c0_0 = arith.constant 0 : index
    %1 = vector.load %arg9[%c0, %c0_0] : memref<16x640xf32, #tpu.memory_space<vmem>>, vector<16x128xf32>
    tpu.vector_store %arg9[%c0, %c0_0], %0 {strides = array<i32>} : memref<16x640xf32, #tpu.memory_space<vmem>>, vector<16x128xf32>,
    %cst_1 = arith.constant 0.000000e+00 : f32
    %2 = vector.broadcast %cst_1 : f32 to vector<16x256xf32>
    %c0_2 = arith.constant 0 : index
    %c384 = arith.constant 384 : index
    %3 = vector.load %arg9[%c0_2, %c384] : memref<16x640xf32, #tpu.memory_space<vmem>>, vector<16x256xf32>
    tpu.vector_store %arg9[%c0_2, %c384], %2 {strides = array<i32>} : memref<16x640xf32, #tpu.memory_space<vmem>>, vector<16x256xf32>,
    %c0_3 = arith.constant 0 : index
    %c0_4 = arith.constant 0 : index
    %c0_5 = arith.constant 0 : index
    %4 = vector.load %arg1[%c0_3, %c0_4, %c0_5] : memref<1x16x256xf32, #tpu.memory_space<vmem>>, vector<1x16x256xf32>
    %5 = vector.shape_cast %4 : vector<1x16x256xf32> to vector<16x256xf32>
    %c0_6 = arith.constant 0 : index
    %c128 = arith.constant 128 : index
    %6 = vector.load %arg9[%c0_6, %c128] : memref<16x640xf32, #tpu.memory_space<vmem>>, vector<16x256xf32>
    tpu.vector_store %arg9[%c0_6, %c128], %5 {strides = array<i32>} : memref<16x640xf32, #tpu.memory_space<vmem>>, vector<16x256xf32>,
    %c0_7 = arith.constant 0 : index
    %c77 = arith.constant 77 : index
    %7 = vector.load %arg9[%c0_7, %c77] : memref<16x640xf32, #tpu.memory_space<vmem>>, vector<16x384xf32>
    %c0_8 = arith.constant 0 : index
    %c0_9 = arith.constant 0 : index
    %8 = vector.load %arg10[%c0_8, %c0_9] : memref<112x384xf32, #tpu.memory_space<vmem>>, vector<16x384xf32>
    tpu.vector_store %arg10[%c0_8, %c0_9], %7 {strides = array<i32>} : memref<112x384xf32, #tpu.memory_space<vmem>>, vector<16x384xf32>,
    %c0_10 = arith.constant 0 : index
    %c93 = arith.constant 93 : index
    %9 = vector.load %arg9[%c0_10, %c93] : memref<16x640xf32, #tpu.memory_space<vmem>>, vector<16x384xf32>
    %c16 = arith.constant 16 : index
    %c0_11 = arith.constant 0 : index
    %10 = vector.load %arg10[%c16, %c0_11] : memref<112x384xf32, #tpu.memory_space<vmem>>, vector<16x384xf32>
    tpu.vector_store %arg10[%c16, %c0_11], %9 {strides = array<i32>} : memref<112x384xf32, #tpu.memory_space<vmem>>, vector<16x384xf32>,
    %c0_12 = arith.constant 0 : index
    %c109 = arith.constant 109 : index
    %11 = vector.load %arg9[%c0_12, %c109] : memref<16x640xf32, #tpu.memory_space<vmem>>, vector<16x384xf32>
    %c32 = arith.constant 32 : index
    %c0_13 = arith.constant 0 : index
    %12 = vector.load %arg10[%c32, %c0_13] : memref<112x384xf32, #tpu.memory_space<vmem>>, vector<16x384xf32>
    tpu.vector_store %arg10[%c32, %c0_13], %11 {strides = array<i32>} : memref<112x384xf32, #tpu.memory_space<vmem>>, vector<16x384xf32>,
    %c0_14 = arith.constant 0 : index
    %c125 = arith.constant 125 : index
    %13 = vector.load %arg9[%c0_14, %c125] : memref<16x640xf32, #tpu.memory_space<vmem>>, vector<16x384xf32>
    %c48 = arith.constant 48 : index
    %c0_15 = arith.constant 0 : index
    %14 = vector.load %arg10[%c48, %c0_15] : memref<112x384xf32, #tpu.memory_space<vmem>>, vector<16x384xf32>
    tpu.vector_store %arg10[%c48, %c0_15], %13 {strides = array<i32>} : memref<112x384xf32, #tpu.memory_space<vmem>>, vector<16x384xf32>,
    %c0_16 = arith.constant 0 : index
    %c141 = arith.constant 141 : index
    %15 = vector.load %arg9[%c0_16, %c141] : memref<16x640xf32, #tpu.memory_space<vmem>>, vector<16x384xf32>
    %c64 = arith.constant 64 : index
    %c0_17 = arith.constant 0 : index
    %16 = vector.load %arg10[%c64, %c0_17] : memref<112x384xf32, #tpu.memory_space<vmem>>, vector<16x384xf32>
    tpu.vector_store %arg10[%c64, %c0_17], %15 {strides = array<i32>} : memref<112x384xf32, #tpu.memory_space<vmem>>, vector<16x384xf32>,
    %c0_18 = arith.constant 0 : index
    %c157 = arith.constant 157 : index
    %17 = vector.load %arg9[%c0_18, %c157] : memref<16x640xf32, #tpu.memory_space<vmem>>, vector<16x384xf32>
    %c80 = arith.constant 80 : index
    %c0_19 = arith.constant 0 : index
    %18 = vector.load %arg10[%c80, %c0_19] : memref<112x384xf32, #tpu.memory_space<vmem>>, vector<16x384xf32>
    tpu.vector_store %arg10[%c80, %c0_19], %17 {strides = array<i32>} : memref<112x384xf32, #tpu.memory_space<vmem>>, vector<16x384xf32>,
    %c0_20 = arith.constant 0 : index
    %c173 = arith.constant 173 : index
    %19 = vector.load %arg9[%c0_20, %c173] : memref<16x640xf32, #tpu.memory_space<vmem>>, vector<16x384xf32>
    %c96 = arith.constant 96 : index
    %c0_21 = arith.constant 0 : index
    %20 = vector.load %arg10[%c96, %c0_21] : memref<112x384xf32, #tpu.memory_space<vmem>>, vector<16x384xf32>
    tpu.vector_store %arg10[%c96, %c0_21], %19 {strides = array<i32>} : memref<112x384xf32, #tpu.memory_space<vmem>>, vector<16x384xf32>,
    %c0_22 = arith.constant 0 : index
    %c0_23 = arith.constant 0 : index
    %21 = vector.load %arg4[%c0_22, %c0_23] : memref<112x112xf32, #tpu.memory_space<vmem>>, vector<112x112xf32>
    %c0_24 = arith.constant 0 : index
    %c0_25 = arith.constant 0 : index
    %22 = vector.load %arg10[%c0_24, %c0_25] : memref<112x384xf32, #tpu.memory_space<vmem>>, vector<112x384xf32>
    %cst_26 = arith.constant dense<0.000000e+00> : vector<112x384xf32>
    %23 = tpu.matmul %21, %22, %cst_26 {dimension_numbers = #tpu.dot_dimension_numbers<[1], [0], [0], [1], [0, 0, 1, 1], [], []>} : vector<112x112xf32>, vector<112x384xf32>, vector<112x384xf32> -> vector<112x384xf32>
    %c0_27 = arith.constant 0 : index
    %c0_28 = arith.constant 0 : index
    %24 = vector.load %arg11[%c0_27, %c0_28] : memref<112x384xf32, #tpu.memory_space<vmem>>, vector<112x384xf32>
    tpu.vector_store %arg11[%c0_27, %c0_28], %23 {strides = array<i32>} : memref<112x384xf32, #tpu.memory_space<vmem>>, vector<112x384xf32>,
    %c0_29 = arith.constant 0 : index
    %c0_30 = arith.constant 0 : index
    %25 = vector.load %arg5[%c0_29, %c0_30] : memref<16x1xf32, #tpu.memory_space<vmem>>, vector<16x1xf32>
    %26 = tpu.iota {dimensions = array<i32: 1>} : vector<1x256xi32>
    %c0_i32 = arith.constant 0 : i32
    %27 = vector.broadcast %c0_i32 : i32 to vector<1x256xi32>
    %28 = arith.addi %26, %27 : vector<1x256xi32>
    %c15_i32 = arith.constant 15 : i32
    %29 = vector.broadcast %c15_i32 : i32 to vector<1x256xi32>
    %30 = arith.andi %28, %29 : vector<1x256xi32>
    %c0_31 = arith.constant 0 : index
    %c0_32 = arith.constant 0 : index
    %c0_33 = arith.constant 0 : index
    %31 = vector.load %arg2[%c0_31, %c0_32, %c0_33] : memref<1x16x256xf32, #tpu.memory_space<vmem>>, vector<1x16x256xf32>
    %32 = vector.shape_cast %31 : vector<1x16x256xf32> to vector<16x256xf32>
    %33 = vector.broadcast %25 : vector<16x1xf32> to vector<16x256xf32>
    %34 = arith.addf %32, %33 : vector<16x256xf32>
    %c0_34 = arith.constant 0 : index
    %c0_35 = arith.constant 0 : index
    %35 = vector.load %arg11[%c0_34, %c0_35] : memref<112x384xf32, #tpu.memory_space<vmem>>, vector<16x256xf32>
    %c3_i32 = arith.constant 3 : i32
    %36 = vector.broadcast %c3_i32 : i32 to vector<1x256xi32>
    %37 = arith.cmpi sge, %30, %36 : vector<1x256xi32>
    %cst_36 = arith.constant 0.000000e+00 : f32
    %38 = vector.shape_cast %37 : vector<1x256xi1> to vector<1x256xi1>
    %39 = vector.broadcast %38 : vector<1x256xi1> to vector<16x256xi1>
    %40 = vector.broadcast %cst_36 : f32 to vector<16x256xf32>
    %41 = arith.select %39, %35, %40 : vector<16x256xi1>, vector<16x256xf32>
    %42 = arith.addf %34, %41 : vector<16x256xf32>
    %c16_37 = arith.constant 16 : index
    %c1 = arith.constant 1 : index
    %43 = vector.load %arg11[%c16_37, %c1] : memref<112x384xf32, #tpu.memory_space<vmem>>, vector<16x256xf32>
    %c2_i32 = arith.constant 2 : i32
    %44 = vector.broadcast %c2_i32 : i32 to vector<1x256xi32>
    %45 = arith.cmpi sge, %30, %44 : vector<1x256xi32>
    %cst_38 = arith.constant 0.000000e+00 : f32
    %46 = vector.shape_cast %45 : vector<1x256xi1> to vector<1x256xi1>
    %47 = vector.broadcast %46 : vector<1x256xi1> to vector<16x256xi1>
    %48 = vector.broadcast %cst_38 : f32 to vector<16x256xf32>
    %49 = arith.select %47, %43, %48 : vector<16x256xi1>, vector<16x256xf32>
    %50 = arith.addf %42, %49 : vector<16x256xf32>
    %c32_39 = arith.constant 32 : index
    %c2 = arith.constant 2 : index
    %51 = vector.load %arg11[%c32_39, %c2] : memref<112x384xf32, #tpu.memory_space<vmem>>, vector<16x256xf32>
    %c1_i32 = arith.constant 1 : i32
    %52 = vector.broadcast %c1_i32 : i32 to vector<1x256xi32>
    %53 = arith.cmpi sge, %30, %52 : vector<1x256xi32>
    %cst_40 = arith.constant 0.000000e+00 : f32
    %54 = vector.shape_cast %53 : vector<1x256xi1> to vector<1x256xi1>
    %55 = vector.broadcast %54 : vector<1x256xi1> to vector<16x256xi1>
    %56 = vector.broadcast %cst_40 : f32 to vector<16x256xf32>
    %57 = arith.select %55, %51, %56 : vector<16x256xi1>, vector<16x256xf32>
    %58 = arith.addf %50, %57 : vector<16x256xf32>
    %c48_41 = arith.constant 48 : index
    %c3 = arith.constant 3 : index
    %59 = vector.load %arg11[%c48_41, %c3] : memref<112x384xf32, #tpu.memory_space<vmem>>, vector<16x256xf32>
    %60 = arith.addf %58, %59 : vector<16x256xf32>
    %c64_42 = arith.constant 64 : index
    %c4 = arith.constant 4 : index
    %61 = vector.load %arg11[%c64_42, %c4] : memref<112x384xf32, #tpu.memory_space<vmem>>, vector<16x256xf32>
    %c15_i32_43 = arith.constant 15 : i32
    %62 = vector.broadcast %c15_i32_43 : i32 to vector<1x256xi32>
    %63 = arith.cmpi slt, %30, %62 : vector<1x256xi32>
    %cst_44 = arith.constant 0.000000e+00 : f32
    %64 = vector.shape_cast %63 : vector<1x256xi1> to vector<1x256xi1>
    %65 = vector.broadcast %64 : vector<1x256xi1> to vector<16x256xi1>
    %66 = vector.broadcast %cst_44 : f32 to vector<16x256xf32>
    %67 = arith.select %65, %61, %66 : vector<16x256xi1>, vector<16x256xf32>
    %68 = arith.addf %60, %67 : vector<16x256xf32>
    %c80_45 = arith.constant 80 : index
    %c5 = arith.constant 5 : index
    %69 = vector.load %arg11[%c80_45, %c5] : memref<112x384xf32, #tpu.memory_space<vmem>>, vector<16x256xf32>
    %c14_i32 = arith.constant 14 : i32
    %70 = vector.broadcast %c14_i32 : i32 to vector<1x256xi32>
    %71 = arith.cmpi slt, %30, %70 : vector<1x256xi32>
    %cst_46 = arith.constant 0.000000e+00 : f32
    %72 = vector.shape_cast %71 : vector<1x256xi1> to vector<1x256xi1>
    %73 = vector.broadcast %72 : vector<1x256xi1> to vector<16x256xi1>
    %74 = vector.broadcast %cst_46 : f32 to vector<16x256xf32>
    %75 = arith.select %73, %69, %74 : vector<16x256xi1>, vector<16x256xf32>
    %76 = arith.addf %68, %75 : vector<16x256xf32>
    %c96_47 = arith.constant 96 : index
    %c6 = arith.constant 6 : index
    %77 = vector.load %arg11[%c96_47, %c6] : memref<112x384xf32, #tpu.memory_space<vmem>>, vector<16x256xf32>
    %c13_i32 = arith.constant 13 : i32
    %78 = vector.broadcast %c13_i32 : i32 to vector<1x256xi32>
    %79 = arith.cmpi slt, %30, %78 : vector<1x256xi32>
    %cst_48 = arith.constant 0.000000e+00 : f32
    %80 = vector.shape_cast %79 : vector<1x256xi1> to vector<1x256xi1>
    %81 = vector.broadcast %80 : vector<1x256xi1> to vector<16x256xi1>
    %82 = vector.broadcast %cst_48 : f32 to vector<16x256xf32>
    %83 = arith.select %81, %77, %82 : vector<16x256xi1>, vector<16x256xf32>
    %84 = arith.addf %76, %83 : vector<16x256xf32>
    %cst_49 = arith.constant 0.000000e+00 : f32
    %85 = vector.broadcast %cst_49 : f32 to vector<16x256xf32>
    %86 = arith.maximumf %84, %85 : vector<16x256xf32>
    %c0_50 = arith.constant 0 : index
    %c128_51 = arith.constant 128 : index
    %87 = vector.load %arg9[%c0_50, %c128_51] : memref<16x640xf32, #tpu.memory_space<vmem>>, vector<16x256xf32>
    tpu.vector_store %arg9[%c0_50, %c128_51], %86 {strides = array<i32>} : memref<16x640xf32, #tpu.memory_space<vmem>>, vector<16x256xf32>,
    %c0_52 = arith.constant 0 : index
    %c77_53 = arith.constant 77 : index
    %88 = vector.load %arg9[%c0_52, %c77_53] : memref<16x640xf32, #tpu.memory_space<vmem>>, vector<16x384xf32>
    %c0_54 = arith.constant 0 : index
    %c0_55 = arith.constant 0 : index
    %89 = vector.load %arg10[%c0_54, %c0_55] : memref<112x384xf32, #tpu.memory_space<vmem>>, vector<16x384xf32>
    tpu.vector_store %arg10[%c0_54, %c0_55], %88 {strides = array<i32>} : memref<112x384xf32, #tpu.memory_space<vmem>>, vector<16x384xf32>,
    %c0_56 = arith.constant 0 : index
    %c93_57 = arith.constant 93 : index
    %90 = vector.load %arg9[%c0_56, %c93_57] : memref<16x640xf32, #tpu.memory_space<vmem>>, vector<16x384xf32>
    %c16_58 = arith.constant 16 : index
    %c0_59 = arith.constant 0 : index
    %91 = vector.load %arg10[%c16_58, %c0_59] : memref<112x384xf32, #tpu.memory_space<vmem>>, vector<16x384xf32>
    tpu.vector_store %arg10[%c16_58, %c0_59], %90 {strides = array<i32>} : memref<112x384xf32, #tpu.memory_space<vmem>>, vector<16x384xf32>,
    %c0_60 = arith.constant 0 : index
    %c109_61 = arith.constant 109 : index
    %92 = vector.load %arg9[%c0_60, %c109_61] : memref<16x640xf32, #tpu.memory_space<vmem>>, vector<16x384xf32>
    %c32_62 = arith.constant 32 : index
    %c0_63 = arith.constant 0 : index
    %93 = vector.load %arg10[%c32_62, %c0_63] : memref<112x384xf32, #tpu.memory_space<vmem>>, vector<16x384xf32>
    tpu.vector_store %arg10[%c32_62, %c0_63], %92 {strides = array<i32>} : memref<112x384xf32, #tpu.memory_space<vmem>>, vector<16x384xf32>,
    %c0_64 = arith.constant 0 : index
    %c125_65 = arith.constant 125 : index
    %94 = vector.load %arg9[%c0_64, %c125_65] : memref<16x640xf32, #tpu.memory_space<vmem>>, vector<16x384xf32>
    %c48_66 = arith.constant 48 : index
    %c0_67 = arith.constant 0 : index
    %95 = vector.load %arg10[%c48_66, %c0_67] : memref<112x384xf32, #tpu.memory_space<vmem>>, vector<16x384xf32>
    tpu.vector_store %arg10[%c48_66, %c0_67], %94 {strides = array<i32>} : memref<112x384xf32, #tpu.memory_space<vmem>>, vector<16x384xf32>,
    %c0_68 = arith.constant 0 : index
    %c141_69 = arith.constant 141 : index
    %96 = vector.load %arg9[%c0_68, %c141_69] : memref<16x640xf32, #tpu.memory_space<vmem>>, vector<16x384xf32>
    %c64_70 = arith.constant 64 : index
    %c0_71 = arith.constant 0 : index
    %97 = vector.load %arg10[%c64_70, %c0_71] : memref<112x384xf32, #tpu.memory_space<vmem>>, vector<16x384xf32>
    tpu.vector_store %arg10[%c64_70, %c0_71], %96 {strides = array<i32>} : memref<112x384xf32, #tpu.memory_space<vmem>>, vector<16x384xf32>,
    %c0_72 = arith.constant 0 : index
    %c157_73 = arith.constant 157 : index
    %98 = vector.load %arg9[%c0_72, %c157_73] : memref<16x640xf32, #tpu.memory_space<vmem>>, vector<16x384xf32>
    %c80_74 = arith.constant 80 : index
    %c0_75 = arith.constant 0 : index
    %99 = vector.load %arg10[%c80_74, %c0_75] : memref<112x384xf32, #tpu.memory_space<vmem>>, vector<16x384xf32>
    tpu.vector_store %arg10[%c80_74, %c0_75], %98 {strides = array<i32>} : memref<112x384xf32, #tpu.memory_space<vmem>>, vector<16x384xf32>,
    %c0_76 = arith.constant 0 : index
    %c173_77 = arith.constant 173 : index
    %100 = vector.load %arg9[%c0_76, %c173_77] : memref<16x640xf32, #tpu.memory_space<vmem>>, vector<16x384xf32>
    %c96_78 = arith.constant 96 : index
    %c0_79 = arith.constant 0 : index
    %101 = vector.load %arg10[%c96_78, %c0_79] : memref<112x384xf32, #tpu.memory_space<vmem>>, vector<16x384xf32>
    tpu.vector_store %arg10[%c96_78, %c0_79], %100 {strides = array<i32>} : memref<112x384xf32, #tpu.memory_space<vmem>>, vector<16x384xf32>,
    %c0_80 = arith.constant 0 : index
    %c0_81 = arith.constant 0 : index
    %102 = vector.load %arg6[%c0_80, %c0_81] : memref<112x112xf32, #tpu.memory_space<vmem>>, vector<112x112xf32>
    %c0_82 = arith.constant 0 : index
    %c0_83 = arith.constant 0 : index
    %103 = vector.load %arg10[%c0_82, %c0_83] : memref<112x384xf32, #tpu.memory_space<vmem>>, vector<112x384xf32>
    %cst_84 = arith.constant dense<0.000000e+00> : vector<112x384xf32>
    %104 = tpu.matmul %102, %103, %cst_84 {dimension_numbers = #tpu.dot_dimension_numbers<[1], [0], [0], [1], [0, 0, 1, 1], [], []>} : vector<112x112xf32>, vector<112x384xf32>, vector<112x384xf32> -> vector<112x384xf32>
    %c0_85 = arith.constant 0 : index
    %c0_86 = arith.constant 0 : index
    %105 = vector.load %arg11[%c0_85, %c0_86] : memref<112x384xf32, #tpu.memory_space<vmem>>, vector<112x384xf32>
    tpu.vector_store %arg11[%c0_85, %c0_86], %104 {strides = array<i32>} : memref<112x384xf32, #tpu.memory_space<vmem>>, vector<112x384xf32>,
    %c0_87 = arith.constant 0 : index
    %c0_88 = arith.constant 0 : index
    %106 = vector.load %arg7[%c0_87, %c0_88] : memref<16x1xf32, #tpu.memory_space<vmem>>, vector<16x1xf32>
    %107 = tpu.iota {dimensions = array<i32: 1>} : vector<1x256xi32>
    %c0_i32_89 = arith.constant 0 : i32
    %108 = vector.broadcast %c0_i32_89 : i32 to vector<1x256xi32>
    %109 = arith.addi %107, %108 : vector<1x256xi32>
    %c15_i32_90 = arith.constant 15 : i32
    %110 = vector.broadcast %c15_i32_90 : i32 to vector<1x256xi32>
    %111 = arith.andi %109, %110 : vector<1x256xi32>
    %c0_91 = arith.constant 0 : index
    %c0_92 = arith.constant 0 : index
    %c0_93 = arith.constant 0 : index
    %112 = vector.load %arg3[%c0_91, %c0_92, %c0_93] : memref<1x16x256xf32, #tpu.memory_space<vmem>>, vector<1x16x256xf32>
    %113 = vector.shape_cast %112 : vector<1x16x256xf32> to vector<16x256xf32>
    %114 = vector.broadcast %106 : vector<16x1xf32> to vector<16x256xf32>
    %115 = arith.addf %113, %114 : vector<16x256xf32>
    %c0_94 = arith.constant 0 : index
    %c0_95 = arith.constant 0 : index
    %116 = vector.load %arg11[%c0_94, %c0_95] : memref<112x384xf32, #tpu.memory_space<vmem>>, vector<16x256xf32>
    %c3_i32_96 = arith.constant 3 : i32
    %117 = vector.broadcast %c3_i32_96 : i32 to vector<1x256xi32>
    %118 = arith.cmpi sge, %111, %117 : vector<1x256xi32>
    %cst_97 = arith.constant 0.000000e+00 : f32
    %119 = vector.shape_cast %118 : vector<1x256xi1> to vector<1x256xi1>
    %120 = vector.broadcast %119 : vector<1x256xi1> to vector<16x256xi1>
    %121 = vector.broadcast %cst_97 : f32 to vector<16x256xf32>
    %122 = arith.select %120, %116, %121 : vector<16x256xi1>, vector<16x256xf32>
    %123 = arith.addf %115, %122 : vector<16x256xf32>
    %c16_98 = arith.constant 16 : index
    %c1_99 = arith.constant 1 : index
    %124 = vector.load %arg11[%c16_98, %c1_99] : memref<112x384xf32, #tpu.memory_space<vmem>>, vector<16x256xf32>
    %c2_i32_100 = arith.constant 2 : i32
    %125 = vector.broadcast %c2_i32_100 : i32 to vector<1x256xi32>
    %126 = arith.cmpi sge, %111, %125 : vector<1x256xi32>
    %cst_101 = arith.constant 0.000000e+00 : f32
    %127 = vector.shape_cast %126 : vector<1x256xi1> to vector<1x256xi1>
    %128 = vector.broadcast %127 : vector<1x256xi1> to vector<16x256xi1>
    %129 = vector.broadcast %cst_101 : f32 to vector<16x256xf32>
    %130 = arith.select %128, %124, %129 : vector<16x256xi1>, vector<16x256xf32>
    %131 = arith.addf %123, %130 : vector<16x256xf32>
    %c32_102 = arith.constant 32 : index
    %c2_103 = arith.constant 2 : index
    %132 = vector.load %arg11[%c32_102, %c2_103] : memref<112x384xf32, #tpu.memory_space<vmem>>, vector<16x256xf32>
    %c1_i32_104 = arith.constant 1 : i32
    %133 = vector.broadcast %c1_i32_104 : i32 to vector<1x256xi32>
    %134 = arith.cmpi sge, %111, %133 : vector<1x256xi32>
    %cst_105 = arith.constant 0.000000e+00 : f32
    %135 = vector.shape_cast %134 : vector<1x256xi1> to vector<1x256xi1>
    %136 = vector.broadcast %135 : vector<1x256xi1> to vector<16x256xi1>
    %137 = vector.broadcast %cst_105 : f32 to vector<16x256xf32>
    %138 = arith.select %136, %132, %137 : vector<16x256xi1>, vector<16x256xf32>
    %139 = arith.addf %131, %138 : vector<16x256xf32>
    %c48_106 = arith.constant 48 : index
    %c3_107 = arith.constant 3 : index
    %140 = vector.load %arg11[%c48_106, %c3_107] : memref<112x384xf32, #tpu.memory_space<vmem>>, vector<16x256xf32>
    %141 = arith.addf %139, %140 : vector<16x256xf32>
    %c64_108 = arith.constant 64 : index
    %c4_109 = arith.constant 4 : index
    %142 = vector.load %arg11[%c64_108, %c4_109] : memref<112x384xf32, #tpu.memory_space<vmem>>, vector<16x256xf32>
    %c15_i32_110 = arith.constant 15 : i32
    %143 = vector.broadcast %c15_i32_110 : i32 to vector<1x256xi32>
    %144 = arith.cmpi slt, %111, %143 : vector<1x256xi32>
    %cst_111 = arith.constant 0.000000e+00 : f32
    %145 = vector.shape_cast %144 : vector<1x256xi1> to vector<1x256xi1>
    %146 = vector.broadcast %145 : vector<1x256xi1> to vector<16x256xi1>
    %147 = vector.broadcast %cst_111 : f32 to vector<16x256xf32>
    %148 = arith.select %146, %142, %147 : vector<16x256xi1>, vector<16x256xf32>
    %149 = arith.addf %141, %148 : vector<16x256xf32>
    %c80_112 = arith.constant 80 : index
    %c5_113 = arith.constant 5 : index
    %150 = vector.load %arg11[%c80_112, %c5_113] : memref<112x384xf32, #tpu.memory_space<vmem>>, vector<16x256xf32>
    %c14_i32_114 = arith.constant 14 : i32
    %151 = vector.broadcast %c14_i32_114 : i32 to vector<1x256xi32>
    %152 = arith.cmpi slt, %111, %151 : vector<1x256xi32>
    %cst_115 = arith.constant 0.000000e+00 : f32
    %153 = vector.shape_cast %152 : vector<1x256xi1> to vector<1x256xi1>
    %154 = vector.broadcast %153 : vector<1x256xi1> to vector<16x256xi1>
    %155 = vector.broadcast %cst_115 : f32 to vector<16x256xf32>
    %156 = arith.select %154, %150, %155 : vector<16x256xi1>, vector<16x256xf32>
    %157 = arith.addf %149, %156 : vector<16x256xf32>
    %c96_116 = arith.constant 96 : index
    %c6_117 = arith.constant 6 : index
    %158 = vector.load %arg11[%c96_116, %c6_117] : memref<112x384xf32, #tpu.memory_space<vmem>>, vector<16x256xf32>
    %c13_i32_118 = arith.constant 13 : i32
    %159 = vector.broadcast %c13_i32_118 : i32 to vector<1x256xi32>
    %160 = arith.cmpi slt, %111, %159 : vector<1x256xi32>
    %cst_119 = arith.constant 0.000000e+00 : f32
    %161 = vector.shape_cast %160 : vector<1x256xi1> to vector<1x256xi1>
    %162 = vector.broadcast %161 : vector<1x256xi1> to vector<16x256xi1>
    %163 = vector.broadcast %cst_119 : f32 to vector<16x256xf32>
    %164 = arith.select %162, %158, %163 : vector<16x256xi1>, vector<16x256xf32>
    %165 = arith.addf %157, %164 : vector<16x256xf32>
    %c0_120 = arith.constant 0 : index
    %c0_121 = arith.constant 0 : index
    %c0_122 = arith.constant 0 : index
    %166 = vector.load %arg8[%c0_120, %c0_121, %c0_122] : memref<1x16x256xf32, #tpu.memory_space<vmem>>, vector<1x16x256xf32>
    %167 = vector.shape_cast %166 : vector<1x16x256xf32> to vector<16x256xf32>
    %168 = vector.shape_cast %165 : vector<16x256xf32> to vector<1x16x256xf32>
    tpu.vector_store %arg8[%c0_120, %c0_121, %c0_122], %168 {strides = array<i32>} : memref<1x16x256xf32, #tpu.memory_space<vmem>>, vector<1x16x256xf32>,
    return
  }
  func.func @transform_0(%arg0: i32) -> (i32, i32, i32) {
    %c0_i32 = arith.constant 0 : i32
    %c0_i32_0 = arith.constant 0 : i32
    %c0_i32_1 = arith.constant 0 : i32
    return %arg0, %c0_i32, %c0_i32_0 : i32, i32, i32
  }
  func.func @transform_1(%arg0: i32) -> (i32, i32, i32) {
    %c0_i32 = arith.constant 0 : i32
    %c0_i32_0 = arith.constant 0 : i32
    %c0_i32_1 = arith.constant 0 : i32
    return %arg0, %c0_i32, %c0_i32_0 : i32, i32, i32
  }
  func.func @transform_2(%arg0: i32) -> (i32, i32, i32) {
    %c0_i32 = arith.constant 0 : i32
    %c0_i32_0 = arith.constant 0 : i32
    %c0_i32_1 = arith.constant 0 : i32
    return %arg0, %c0_i32, %c0_i32_0 : i32, i32, i32
  }
  func.func @transform_3(%arg0: i32) -> (i32, i32) {
    %c0_i32 = arith.constant 0 : i32
    %c0_i32_0 = arith.constant 0 : i32
    %c0_i32_1 = arith.constant 0 : i32
    return %c0_i32, %c0_i32_0 : i32, i32
  }
  func.func @transform_4(%arg0: i32) -> (i32, i32) {
    %c0_i32 = arith.constant 0 : i32
    %c0_i32_0 = arith.constant 0 : i32
    %c0_i32_1 = arith.constant 0 : i32
    return %c0_i32, %c0_i32_0 : i32, i32
  }
  func.func @transform_5(%arg0: i32) -> (i32, i32) {
    %c0_i32 = arith.constant 0 : i32
    %c0_i32_0 = arith.constant 0 : i32
    %c0_i32_1 = arith.constant 0 : i32
    return %c0_i32, %c0_i32_0 : i32, i32
  }
  func.func @transform_6(%arg0: i32) -> (i32, i32) {
    %c0_i32 = arith.constant 0 : i32
    %c0_i32_0 = arith.constant 0 : i32
    %c0_i32_1 = arith.constant 0 : i32
    return %c0_i32, %c0_i32_0 : i32, i32
  }
  func.func @transform_7(%arg0: i32) -> (i32, i32, i32) {
    %c0_i32 = arith.constant 0 : i32
    %c0_i32_0 = arith.constant 0 : i32
    %c0_i32_1 = arith.constant 0 : i32
    return %arg0, %c0_i32, %c0_i32_0 : i32, i32, i32
  }
}

</mosaic_0001>

<bundles_post_ra>
// kernel: model_forward.1
= control target key start
LH: loop header
LB: loop body
LE: loop exit
PB: predicated region body
PF: predicated region fallthrough
CT: control target
= control target key end

     0   :  { %s2945_s24 = smov 0   ;;  %s3929_s0 = inlined_call_operand.vmem [shape: f32[2,16,256], index: 0, kind: input, shape index: {}]   ;;  %s3930_s1 = inlined_call_operand.vmem [shape: f32[2,16,256], index: 1, kind: input, shape index: {}]   ;;  %s3931_s2 = inlined_call_operand.vmem [shape: f32[2,16,256], index: 2, kind: input, shape index: {}]   ;;  %s3932_s3 = inlined_call_operand.vmem [shape: f32[112,112], index: 3, kind: input, shape index: {}]   ;;  %s3933_s4 = inlined_call_operand.vmem [shape: f32[16,1], index: 4, kind: input, shape index: {}]   ;;  %s3934_s5 = inlined_call_operand.vmem [shape: f32[112,112], index: 5, kind: input, shape index: {}]   ;;  %s3935_s6 = inlined_call_operand.vmem [shape: f32[16,1], index: 6, kind: input, shape index: {}]   ;;  %s3936_s7 = inlined_call_operand.vmem [shape: f32[2,16,256], index: 7, kind: output, shape index: {}]  }
   0x1 LB: > { %s2563_s25 = sadd.s32 4294967295, %s2888_s24   ;;  %p2567_p0 = scmp.ge.s32.totalorder %s2888_s24, 1  ;;  %s2888_s24 = sphi %s2945_s24, %s17_s24  }
   0x2   : > { %p257_p1 = scmp.lt.s32.totalorder %s2888_s24, 3 }
   0x4   : > { %p258_p2 = pnand %p2567_p0, %p257_p1 }
   0x5   : > { %p299_p3 = scmp.lt.s32.totalorder (!%p258_p2), %s2563_s25, 1  ;;  %s2891_s26 = smov (!%p258_p2), 83  }
   0x6   : > { %261 = sbr.rel (%p258_p2) target bundleno = 1208 (0x4b8), region = 48  ;;  %s2892_s8 = smov (!%p258_p2), 99  }
   0x7   : > { %s2893_s9 = smov (!%p258_p2), 115   ;;  %s2894_s10 = smov (!%p258_p2), 3  }
   0x8   : > { %s2895_s11 = smov (!%p258_p2), 19   ;;  %s2896_s12 = smov (!%p258_p2), 35  }
   0x9   : > { %s2897_s13 = smov (!%p258_p2), 51   ;;  %s2899_s18 = smov (!%p258_p2), 127  }
   0xa   : > { %s2900_s19 = smov (!%p258_p2), 126   ;;  %s2901_s20 = smov (!%p258_p2), 125  }
   0xb   : > { %v2890_v0 = vmov 0.0   ;;  %s4039_s25 = smov (!%p299_p3, %s2563_s25), 1  ;;  %v3025_v5 = vld [vmem:[%s3932_s3] sm:$0xff]  ;;  %vm3944_vm0 = vcmask 916480   ;;  %v1116_v8 = vld [vmem:[%s3933_s4 + $0x8] sm:$0xff]  ;;  %v2898_v10 = vmov 0  }
   0xc   : > { %853 = vmatprep.mubr.f32.mxu0 %v2890_v0  ;;  %2816 = vrot.lane.b32.xlu0 %v2890_v0, %s2891_s26  ;;  %s2956_s27 = sshll.u32 %s4039_s25, 5  ;;  %v1115_v7 = vld [vmem:[%s3933_s4] sm:$0xff]  ;;  %vm3943_vm1 = vcmask 678912   ;;  %vm3942_vm2 = vcmask 809984   ;;  %vm3941_vm3 = vcmask 941056   ;;  %vm3940_vm4 = vcmask 23552  }
   0xd   : > { %s303_s30 = scalar_lea.vmem %s3929_s0, %s2956_s27  ;;  %2722 = vmatprep.mubr.msk.f32.mxu1 %vm3944_vm0, %v3025_v5  ;;  %2846 = vset.pattern.permute.xlu1 %v2898_v10  ;;  %vm3939_vm5 = vcmask 154624   ;;  %vm3938_vm6 = vcmask 285696   ;;  %vm3937_vm7 = vcmask 416768   ;;  %s2902_s21 = smov 124   ;;  %vm1188_vm8 = vcmask 1039360  }
   0xe   : > { %v328_v1 = vld [vmem:[%s303_s30 + $0x18] sm:$0xff]  ;;  %v327_v2 = vld [vmem:[%s303_s30 + $0x10] sm:$0xff]  ;;  %v326_v3 = vld [vmem:[%s303_s30 + $0x8] sm:$0xff]  ;;  %2845 = vset.pattern.permute.xlu0 %v2898_v10  ;;  %s2903_s22 = smov 123   ;;  %s2904_s23 = smov 122   ;;  %vm1235_vm11 = vcmask 1031168  }
   0xf   : > { %663 = vrot.lane.b32.xlu1 %v327_v2, %s2891_s26  ;;  %v325_v4 = vld [vmem:[%s303_s30] sm:$0xff]  ;;  %s3332_s29 = scalar_lea.vmem %s3930_s1, %s2956_s27 }
  0x10   : > { %665 = vrot.lane.b32.xlu0 %v328_v1, %s2891_s26 }
  0x13   : > { %657 = vrot.lane.b32.xlu1 %v326_v3, %s2891_s26 }
  0x14   : > { %655 = vrot.lane.b32.xlu0 %v325_v4, %s2891_s26 }
  0x17   : > { %614 = vrot.lane.b32.xlu1 %v328_v1, %s2892_s8 }
  0x18   : > { %2821 = vrot.lane.b32.xlu0 %v2890_v0, %s2892_s8 }
  0x1b   : > { %612 = vrot.lane.b32.xlu1 %v327_v2, %s2892_s8 }
  0x1c   : > { %606 = vrot.lane.b32.xlu0 %v326_v3, %s2892_s8 }
  0x1f   : > { %604 = vrot.lane.b32.xlu1 %v325_v4, %s2892_s8 }
  0x20   : > { %563 = vrot.lane.b32.xlu0 %v328_v1, %s2893_s9 }
  0x23   : > { %2826 = vrot.lane.b32.xlu1 %v2890_v0, %s2893_s9 }
  0x24   : > { %561 = vrot.lane.b32.xlu0 %v327_v2, %s2893_s9 }
  0x27   : > { %555 = vrot.lane.b32.xlu1 %v326_v3, %s2893_s9 }
  0x28   : > { %553 = vrot.lane.b32.xlu0 %v325_v4, %s2893_s9 }
  0x2b   : > { %512 = vrot.lane.b32.xlu1 %v327_v2, %s2894_s10 }
  0x2c   : > { %514 = vrot.lane.b32.xlu0 %v328_v1, %s2894_s10 }
  0x2f   : > { %2831 = vrot.lane.b32.xlu1 %v2890_v0, %s2894_s10 }
  0x30   : > { %504 = vrot.lane.b32.xlu0 %v325_v4, %s2894_s10 }
  0x33   : > { %506 = vrot.lane.b32.xlu1 %v326_v3, %s2894_s10 }
  0x34   : > { %461 = vrot.lane.b32.xlu0 %v327_v2, %s2895_s11 }
  0x37   : > { %463 = vrot.lane.b32.xlu1 %v328_v1, %s2895_s11 }
  0x38   : > { %2836 = vrot.lane.b32.xlu0 %v2890_v0, %s2895_s11 }
  0x3b   : > { %453 = vrot.lane.b32.xlu1 %v325_v4, %s2895_s11 }
  0x3c   : > { %455 = vrot.lane.b32.xlu0 %v326_v3, %s2895_s11 }
  0x3f   : > { %410 = vrot.lane.b32.xlu1 %v327_v2, %s2896_s12 }
  0x40   : > { %412 = vrot.lane.b32.xlu0 %v328_v1, %s2896_s12 }
  0x43   : > { %2841 = vrot.lane.b32.xlu1 %v2890_v0, %s2896_s12 }
  0x44   : > { %402 = vrot.lane.b32.xlu0 %v325_v4, %s2896_s12 }
  0x47   : > { %404 = vrot.lane.b32.xlu1 %v326_v3, %s2896_s12 }
  0x48   : > { %359 = vrot.lane.b32.xlu0 %v327_v2, %s2897_s13 }
  0x4b   : > { %361 = vrot.lane.b32.xlu1 %v328_v1, %s2897_s13 }
  0x4c   : > { %357 = vrot.lane.b32.xlu0 %v2890_v0, %s2897_s13 }
  0x4f   : > { %351 = vrot.lane.b32.xlu1 %v325_v4, %s2897_s13 }
  0x50   : > { %353 = vrot.lane.b32.xlu0 %v326_v3, %s2897_s13 }
  0x53   : > { %349 = vrot.lane.b32.xlu1 %v2890_v0, %s2897_s13 }
  0x54   : > { %669 = vrot.lane.b32.xlu0 %v2890_v0, %s2891_s26 }
  0x57   : > { %661 = vrot.lane.b32.xlu1 %v2890_v0, %s2891_s26 }
  0x58   : > { %618 = vrot.lane.b32.xlu0 %v2890_v0, %s2892_s8 }
  0x5b   : > { %610 = vrot.lane.b32.xlu1 %v2890_v0, %s2892_s8 }
  0x5c   : > { %567 = vrot.lane.b32.xlu0 %v2890_v0, %s2893_s9 }
  0x5f   : > { %559 = vrot.lane.b32.xlu1 %v2890_v0, %s2893_s9 }
  0x60   : > { %516 = vrot.lane.b32.xlu0 %v2890_v0, %s2894_s10 }
  0x63   : > { %508 = vrot.lane.b32.xlu1 %v2890_v0, %s2894_s10 }
  0x64   : > { %465 = vrot.lane.b32.xlu0 %v2890_v0, %s2895_s11 }
  0x67   : > { %457 = vrot.lane.b32.xlu1 %v2890_v0, %s2895_s11 }
  0x68   : > { %414 = vrot.lane.b32.xlu0 %v2890_v0, %s2896_s12 }
  0x6b   : > { %406 = vrot.lane.b32.xlu1 %v2890_v0, %s2896_s12 }
  0x6c   : > { %363 = vrot.lane.b32.xlu0 %v2890_v0, %s2897_s13 }
  0x6f   : > { %355 = vrot.lane.b32.xlu1 %v2890_v0, %s2897_s13 }
  0x70   : > { %1133 = vperm.xlu0 %2845, %v1116_v8  }
  0x73   : > { %1128 = vperm.xlu1 %2846, %v1115_v7  }
  0x7e   : > { %v3039_v6 = vpop.permute.xlu0 %2816 }
  0x7f   : > { %v2818_v9 = vunpack.i.l.bf16 %v3039_v6  ;;  %v2819_v15 = vunpack.i.h.bf16 %v3039_v6 }
  0x81   : > { %v664_v12 = vpop.permute.xlu1 %663 }
  0x82   : > { %v666_v11 = vpop.permute.xlu0 %665 }
  0x83   : > { %v676_v13 = vsel %vm3943_vm1, %v666_v11, %v2818_v9  ;;  %v675_v14 = vsel %vm3943_vm1, %v664_v12, %v666_v11 }
  0x84   : > { %793 = vmatprep.subr.mxu0 %v676_v13 }
  0x85   : > { %794 = vmatpush1.msra.mxu0 %v675_v14  ;;  %v658_v16 = vpop.permute.xlu1 %657 }
  0x86   : > { %v656_v17 = vpop.permute.xlu0 %655  ;;  %v673_v18 = vsel %vm3943_vm1, %v658_v16, %v2819_v15 }
  0x87   : > { %v672_v19 = vsel %vm3943_vm1, %v656_v17, %v658_v16  ;;  %795 = vmatprep.subr.mxu0 %v673_v18 }
  0x88   : > { %796 = vmatpush1.msra.mxu0 %v672_v19 }
  0x89   : > { %v615_v20 = vpop.permute.xlu1 %614 }
  0x8a   : > { %v3057_v21 = vpop.permute.xlu0 %2821 }
  0x8b   : > { %v2824_v22 = vunpack.i.h.bf16 %v3057_v21  ;;  %v2823_v23 = vunpack.i.l.bf16 %v3057_v21 }
  0x8d   : > { %v625_v24 = vsel %vm3942_vm2, %v615_v20, %v2823_v23  ;;  %v613_v25 = vpop.permute.xlu1 %612 }
  0x8e   : > { %v607_v26 = vpop.permute.xlu0 %606  ;;  %797 = vmatprep.subr.mxu0 %v625_v24  ;;  %v624_v27 = vsel %vm3942_vm2, %v613_v25, %v615_v20 }
  0x8f   : > { %v622_v28 = vsel %vm3942_vm2, %v607_v26, %v2824_v22  ;;  %798 = vmatpush1.msra.mxu0 %v624_v27 }
  0x90   : > { %799 = vmatprep.subr.mxu0 %v622_v28 }
  0x91   : > { %v605_v29 = vpop.permute.xlu1 %604 }
  0x92   : > { %v564_v30 = vpop.permute.xlu0 %563  ;;  %v621_v31 = vsel %vm3942_vm2, %v605_v29, %v607_v26 }
  0x93   : > { %800 = vmatpush1.msra.mxu0 %v621_v31 }
  0x95   : > { %v3069_v32 = vpop.permute.xlu1 %2826 }
  0x96   : > { %v562_v33 = vpop.permute.xlu0 %561  ;;  %v2828_v34 = vunpack.i.l.bf16 %v3069_v32  ;;  %v2829_v35 = vunpack.i.h.bf16 %v3069_v32 }
  0x97   : > { %v573_v39 = vsel %vm3941_vm3, %v562_v33, %v564_v30 }
  0x98   : > { %v574_v36 = vsel %vm3941_vm3, %v564_v30, %v2828_v34 }
  0x99   : > { %v556_v37 = vpop.permute.xlu1 %555  ;;  %801 = vmatprep.subr.mxu0 %v574_v36 }
  0x9a   : > { %v554_v38 = vpop.permute.xlu0 %553  ;;  %802 = vmatpush1.msra.mxu0 %v573_v39  ;;  %v571_v40 = vsel %vm3941_vm3, %v556_v37, %v2829_v35 }
  0x9b   : > { %v570_v41 = vsel %vm3941_vm3, %v554_v38, %v556_v37  ;;  %803 = vmatprep.subr.mxu0 %v571_v40  ;;  %v3133_v37 = vld [vmem:[%s3932_s3 + $0x8] sm:$0xff] }
  0x9c   : > { %804 = vmatpush1.msra.mxu0 %v570_v41 }
  0x9d   : > { %v513_v42 = vpop.permute.xlu1 %512 }
  0x9e   : > { %v3081_v43 = vpop.permute.xlu0 %514 }
  0x9f   : > { %v523_v44 = vsel %vm3940_vm4, %v513_v42, %v3081_v43 }
  0xa0   : > { %805 = vmatprep.subr.mxu0 %v523_v44 }
  0xa1   : > { %v2832_v45 = vpop.permute.xlu1 %2831 }
  0xa2   : > { %v505_v46 = vpop.permute.xlu0 %504  ;;  %v2833_v47 = vunpack.i.l.bf16 %v2832_v45  ;;  %v2834_v48 = vunpack.i.h.bf16 %v2832_v45 }
  0xa4   : > { %v522_v49 = vsel %vm3940_vm4, %v2833_v47, %v513_v42  ;;  %v519_v53 = vsel %vm3940_vm4, %v2834_v48, %v505_v46  ;;  %v695_v47 = vld [vmem:[%s3932_s3 + $0x28] sm:$0xff] }
  0xa5   : > { %v3086_v50 = vpop.permute.xlu1 %506  ;;  %806 = vmatpush1.msra.mxu0 %v522_v49 }
  0xa6   : > { %v462_v51 = vpop.permute.xlu0 %461  ;;  %v520_v52 = vsel %vm3940_vm4, %v505_v46, %v3086_v50 }
  0xa7   : > { %807 = vmatprep.subr.mxu0 %v520_v52  ;;  %v696_v52 = vld [vmem:[%s3932_s3 + $0x30] sm:$0xff] }
  0xa8   : > { %808 = vmatpush1.msra.mxu0 %v519_v53 }
  0xa9   : > { %v3091_v54 = vpop.permute.xlu1 %463 }
  0xaa   : > { %v2837_v55 = vpop.permute.xlu0 %2836  ;;  %v472_v58 = vsel %vm3939_vm5, %v462_v51, %v3091_v54 }
  0xab   : > { %v2839_v56 = vunpack.i.h.bf16 %v2837_v55  ;;  %v2838_v57 = vunpack.i.l.bf16 %v2837_v55  ;;  %809 = vmatprep.subr.mxu0 %v472_v58  ;;  %v699_v58 = vld [vmem:[%s3932_s3 + $0x48] sm:$0xff] }
  0xad   : > { %v471_v59 = vsel %vm3939_vm5, %v2838_v57, %v462_v51  ;;  %v454_v60 = vpop.permute.xlu1 %453  ;;  %v698_v57 = vld [vmem:[%s3932_s3 + $0x40] sm:$0xff] }
  0xae   : > { %v3096_v61 = vpop.permute.xlu0 %455  ;;  %810 = vmatpush1.msra.mxu0 %v471_v59  ;;  %v468_v63 = vsel %vm3939_vm5, %v2839_v56, %v454_v60  ;;  %v697_v56 = vld [vmem:[%s3932_s3 + $0x38] sm:$0xff]  ;;  %v700_v59 = vld [vmem:[%s3932_s3 + $0x50] sm:$0xff] }
  0xaf   : > { %v469_v62 = vsel %vm3939_vm5, %v454_v60, %v3096_v61  ;;  %v701_v60 = vld [vmem:[%s3932_s3 + $0x58] sm:$0xff] }
  0xb0   : > { %811 = vmatprep.subr.mxu0 %v469_v62  ;;  %v703_v62 = vld [vmem:[%s3932_s3 + $0x68] sm:$0xff] }
  0xb1   : > { %812 = vmatpush1.msra.mxu0 %v468_v63  ;;  %v411_v1 = vpop.permute.xlu1 %410 }
  0xb2   : > { %v3101_v2 = vpop.permute.xlu0 %412 }
  0xb3   : > { %v421_v3 = vsel %vm3938_vm6, %v411_v1, %v3101_v2 }
  0xb4   : > { %813 = vmatprep.subr.mxu0 %v421_v3 }
  0xb5   : > { %v2842_v4 = vpop.permute.xlu1 %2841 }
  0xb6   : > { %v403_v7 = vpop.permute.xlu0 %402  ;;  %v2843_v8 = vunpack.i.l.bf16 %v2842_v4  ;;  %v2844_v10 = vunpack.i.h.bf16 %v2842_v4 }
  0xb8   : > { %v420_v11 = vsel %vm3938_vm6, %v2843_v8, %v411_v1  ;;  %v417_v16 = vsel %vm3938_vm6, %v2844_v10, %v403_v7 }
  0xb9   : > { %v3106_v12 = vpop.permute.xlu1 %404  ;;  %814 = vmatpush1.msra.mxu0 %v420_v11 }
  0xba   : > { %v360_v13 = vpop.permute.xlu0 %359  ;;  %v418_v14 = vsel %vm3938_vm6, %v403_v7, %v3106_v12 }
  0xbb   : > { %815 = vmatprep.subr.mxu0 %v418_v14 }
  0xbc   : > { %816 = vmatpush1.msra.mxu0 %v417_v16 }
  0xbd   : > { %v3111_v17 = vpop.permute.xlu1 %361 }
  0xbe   : > { %v358_v18 = vpop.permute.xlu0 %357  ;;  %v370_v19 = vsel %vm3937_vm7, %v360_v13, %v3111_v17 }
  0xbf   : > { %v369_v20 = vsel %vm3937_vm7, %v358_v18, %v360_v13  ;;  %817 = vmatprep.subr.mxu0 %v370_v19 }
  0xc0   : > { %818 = vmatpush1.msra.mxu0 %v369_v20 }
  0xc1   : > { %v352_v24 = vpop.permute.xlu1 %351 }
  0xc2   : > { %v3116_v25 = vpop.permute.xlu0 %353 }
  0xc3   : > { %v367_v26 = vsel %vm3937_vm7, %v352_v24, %v3116_v25 }
  0xc4   : > { %819 = vmatprep.subr.mxu0 %v367_v26 }
  0xc5   : > { %v350_v27 = vpop.permute.xlu1 %349 }
  0xc6   : > { %v670_v28 = vpop.permute.xlu0 %669  ;;  %v366_v29 = vsel %vm3937_vm7, %v350_v27, %v352_v24 }
  0xc7   : > { %v677_v30 = vsel %vm3943_vm1, %v2818_v9, %v670_v28  ;;  %820 = vmatpush1.msra.mxu0 %v366_v29 }
  0xc8   : > { %2694 = vmatprep.subr.mxu1 %v677_v30  ;;  %2576 = vmatmul.mubr.msk.f32.vlgmr.msra.gmra.mxu0 %vm3944_vm0, %v3025_v5 }
  0xc9   : > { %2695 = vmatpush3.msra.mxu1 %v677_v30  ;;  %v662_v31 = vpop.permute.xlu1 %661  ;;  %859 = vmatprep.mubr.f32.mxu0 %v2890_v0 }
  0xca   : > { %v619_v33 = vpop.permute.xlu0 %618  ;;  %v674_v36 = vsel %vm3943_vm1, %v2819_v15, %v662_v31  ;;  %v692_v15 = vld [vmem:[%s3932_s3 + $0x10] sm:$0xff] }
  0xcb   : > { %2696 = vmatprep.subr.mxu1 %v674_v36  ;;  %v626_v9 = vsel %vm3942_vm2, %v2823_v23, %v619_v33 }
  0xcc   : > { %2697 = vmatpush3.msra.mxu1 %v674_v36  ;;  %2577 = vmatmul.mubr.msk.f32.gmra.mxu0 %vm3944_vm0, %v3133_v37 }
  0xcd   : > { %v611_v5 = vpop.permute.xlu1 %610  ;;  %2698 = vmatprep.subr.mxu1 %v626_v9  ;;  %865 = vmatprep.mubr.f32.mxu0 %v2890_v0 }
  0xce   : > { %v568_v38 = vpop.permute.xlu0 %567  ;;  %2699 = vmatpush3.msra.mxu1 %v626_v9  ;;  %v623_v6 = vsel %vm3942_vm2, %v2824_v22, %v611_v5  ;;  %v693_v22 = vld [vmem:[%s3932_s3 + $0x18] sm:$0xff] }
  0xcf   : > { %2700 = vmatprep.subr.mxu1 %v623_v6  ;;  %v575_v23 = vsel %vm3941_vm3, %v2828_v34, %v568_v38 }
  0xd0   : > { %2701 = vmatpush3.msra.mxu1 %v623_v6  ;;  %2578 = vmatmul.mubr.msk.f32.gmra.mxu0 %vm3944_vm0, %v692_v15 }
  0xd1   : > { %v560_v39 = vpop.permute.xlu1 %559  ;;  %2702 = vmatprep.subr.mxu1 %v575_v23  ;;  %871 = vmatprep.mubr.f32.mxu0 %v2890_v0 }
  0xd2   : > { %v517_v40 = vpop.permute.xlu0 %516  ;;  %2703 = vmatpush3.msra.mxu1 %v575_v23  ;;  %v572_v21 = vsel %vm3941_vm3, %v2829_v35, %v560_v39  ;;  %v694_v35 = vld [vmem:[%s3932_s3 + $0x20] sm:$0xff] }
  0xd3   : > { %2704 = vmatprep.subr.mxu1 %v572_v21  ;;  %v524_v34 = vsel %vm3940_vm4, %v3081_v43, %v517_v40 }
  0xd4   : > { %2705 = vmatpush3.msra.mxu1 %v572_v21  ;;  %2579 = vmatmul.mubr.msk.f32.gmra.mxu0 %vm3944_vm0, %v693_v22 }
  0xd5   : > { %v509_v41 = vpop.permute.xlu1 %508  ;;  %2706 = vmatprep.subr.mxu1 %v524_v34  ;;  %877 = vmatprep.mubr.f32.mxu0 %v2890_v0 }
  0xd6   : > { %v466_v42 = vpop.permute.xlu0 %465  ;;  %2707 = vmatpush3.msra.mxu1 %v524_v34  ;;  %v521_v32 = vsel %vm3940_vm4, %v3086_v50, %v509_v41 }
  0xd7   : > { %2708 = vmatprep.subr.mxu1 %v521_v32  ;;  %v473_v43 = vsel %vm3939_vm5, %v3091_v54, %v466_v42 }
  0xd8   : > { %2709 = vmatpush3.msra.mxu1 %v521_v32  ;;  %2580 = vmatmul.mubr.msk.f32.gmra.mxu0 %vm3944_vm0, %v694_v35 }
  0xd9   : > { %v458_v44 = vpop.permute.xlu1 %457  ;;  %2710 = vmatprep.subr.mxu1 %v473_v43  ;;  %883 = vmatprep.mubr.f32.mxu0 %v2890_v0 }
  0xda   : > { %v415_v45 = vpop.permute.xlu0 %414  ;;  %2711 = vmatpush3.msra.mxu1 %v473_v43  ;;  %v470_v46 = vsel %vm3939_vm5, %v3096_v61, %v458_v44  ;;  %v702_v61 = vld [vmem:[%s3932_s3 + $0x60] sm:$0xff]  ;;  %vm1366_vm5 = vcmask 1006592  }
  0xdb   : > { %2712 = vmatprep.subr.mxu1 %v470_v46  ;;  %v422_v48 = vsel %vm3938_vm6, %v3101_v2, %v415_v45 }
  0xdc   : > { %2713 = vmatpush3.msra.mxu1 %v470_v46  ;;  %2581 = vmatmul.mubr.msk.f32.gmra.mxu0 %vm3944_vm0, %v695_v47 }
  0xdd   : > { %v407_v49 = vpop.permute.xlu1 %406  ;;  %2714 = vmatprep.subr.mxu1 %v422_v48  ;;  %889 = vmatprep.mubr.f32.mxu0 %v2890_v0 }
  0xde   : > { %v364_v50 = vpop.permute.xlu0 %363  ;;  %2715 = vmatpush3.msra.mxu1 %v422_v48  ;;  %v419_v51 = vsel %vm3938_vm6, %v3106_v12, %v407_v49  ;;  %vm1276_vm6 = vcmask 1022976  }
  0xdf   : > { %2716 = vmatprep.subr.mxu1 %v419_v51  ;;  %v371_v53 = vsel %vm3937_vm7, %v3111_v17, %v364_v50 }
  0xe0   : > { %2717 = vmatpush3.msra.mxu1 %v419_v51  ;;  %2582 = vmatmul.mubr.msk.f32.gmra.mxu0 %vm3944_vm0, %v696_v52 }
  0xe1   : > { %v356_v54 = vpop.permute.xlu1 %355  ;;  %2718 = vmatprep.subr.mxu1 %v371_v53  ;;  %895 = vmatprep.mubr.f32.mxu0 %v2890_v0 }
  0xe2   : > { %2719 = vmatpush3.msra.mxu1 %v371_v53  ;;  %v368_v55 = vsel %vm3937_vm7, %v3116_v25, %v356_v54  ;;  %vm1319_vm7 = vcmask 1014784  }
  0xe3   : > { %2720 = vmatprep.subr.mxu1 %v368_v55 }
  0xe4   : > { %2721 = vmatpush3.msra.mxu1 %v368_v55  ;;  %2583 = vmatmul.mubr.msk.f32.gmra.mxu0 %vm3944_vm0, %v697_v56 }
  0xe5   : > { %2723 = vmatmul.mubr.msk.f32.vlgmr.msra.gmra.mxu1 %vm3944_vm0, %v3133_v37  ;;  %901 = vmatprep.mubr.f32.mxu0 %v2890_v0 }
  0xe6   : > { %2725 = vmatprep.mubr.msk.f32.mxu1 %vm3944_vm0, %v692_v15 }
  0xe8   : > { %2584 = vmatmul.mubr.msk.f32.gmra.mxu0 %vm3944_vm0, %v698_v57 }
  0xe9   : > { %2726 = vmatmul.mubr.msk.f32.gmra.mxu1 %vm3944_vm0, %v693_v22  ;;  %907 = vmatprep.mubr.f32.mxu0 %v2890_v0 }
  0xea   : > { %2728 = vmatprep.mubr.msk.f32.mxu1 %vm3944_vm0, %v694_v35 }
  0xeb   : > { %v3298_v43 = vpop.permute.xlu0 %1133 }
  0xec   : > { %2585 = vmatmul.mubr.msk.f32.gmra.mxu0 %vm3944_vm0, %v699_v58 }
  0xed   : > { %2729 = vmatmul.mubr.msk.f32.gmra.mxu1 %vm3944_vm0, %v695_v47  ;;  %913 = vmatprep.mubr.f32.mxu0 %v2890_v0 }
  0xee   : > { %2731 = vmatprep.mubr.msk.f32.mxu1 %vm3944_vm0, %v696_v52  ;;  %v1129_v35 = vpop.permute.xlu1 %1128 }
  0xf0   : > { %2586 = vmatmul.mubr.msk.f32.gmra.mxu0 %vm3944_vm0, %v700_v59 }
  0xf1   : > { %2732 = vmatmul.mubr.msk.f32.gmra.mxu1 %vm3944_vm0, %v697_v56  ;;  %919 = vmatprep.mubr.f32.mxu0 %v2890_v0 }
  0xf2   : > { %2734 = vmatprep.mubr.msk.f32.mxu1 %vm3944_vm0, %v698_v57 }
  0xf4   : > { %2587 = vmatmul.mubr.msk.f32.gmra.mxu0 %vm3944_vm0, %v701_v60 }
  0xf5   : > { %2735 = vmatmul.mubr.msk.f32.gmra.mxu1 %vm3944_vm0, %v699_v58  ;;  %925 = vmatprep.mubr.f32.mxu0 %v2890_v0 }
  0xf6   : > { %2737 = vmatprep.mubr.msk.f32.mxu1 %vm3944_vm0, %v700_v59 }
  0xf8   : > { %2588 = vmatmul.mubr.msk.f32.gmra.mxu0 %vm3944_vm0, %v702_v61 }
  0xf9   : > { %2738 = vmatmul.mubr.msk.f32.gmra.mxu1 %vm3944_vm0, %v701_v60  ;;  %931 = vmatprep.mubr.f32.mxu0 %v2890_v0 }
  0xfa   : > { %2740 = vmatprep.mubr.msk.f32.mxu1 %vm3944_vm0, %v702_v61 }
  0xfc   : > { %2589 = vmatmul.mubr.msk.f32.gmra.mxu0 %vm3944_vm0, %v703_v62 }
  0xfd   : > { %2741 = vmatmul.mubr.msk.f32.gmra.mxu1 %vm3944_vm0, %v703_v62  ;;  %vm1413_vm0 = vcmask 998400  }
  0xfe   : > { %1950 = vmatprep.mubr.f32.mxu1 %v2890_v0 }
 0x188   : > { %v3240_v63 = vpop.f32.mrf.mxu0 }
 0x18a   : > { %v3242_v1 = vpop.f32.mrf.mxu0 }
 0x18c   : > { %v3244_v2 = vpop.f32.mrf.mxu0 }
 0x18e   : > { %v3246_v3 = vpop.f32.mrf.mxu0 }
 0x190   : > { %v867_v4 = vpop.f32.mrf.mxu0 }
 0x192   : > { %v869_v7 = vpop.f32.mrf.mxu0 }
 0x194   : > { %v873_v8 = vpop.f32.mrf.mxu0 }
 0x196   : > { %v875_v10 = vpop.f32.mrf.mxu0 }
 0x198   : > { %v879_v13 = vpop.f32.mrf.mxu0 }
 0x19a   : > { %v881_v17 = vpop.f32.mrf.mxu0 }
 0x19c   : > { %v885_v20 = vpop.f32.mrf.mxu0 }
 0x19e   : > { %v887_v25 = vpop.f32.mrf.mxu0 }
 0x1a0   : > { %v891_v27 = vpop.f32.mrf.mxu0 }
 0x1a2   : > { %v893_v29 = vpop.f32.mrf.mxu0 }
 0x1a4   : > { %v897_v30 = vpop.f32.mrf.mxu0 }
 0x1a5   : > { %v2724_v11 = vpop.f32.mrf.mxu1 }
 0x1a6   : > { %v899_v33 = vpop.f32.mrf.mxu0 }
 0x1a7   : > { %v1004_v12 = vpop.f32.mrf.mxu1 }
 0x1a8   : > { %v903_v36 = vpop.f32.mrf.mxu0 }
 0x1a9   : > { %v2727_v14 = vpop.f32.mrf.mxu1 }
 0x1aa   : > { %1186 = vrot.lane.b32.xlu0 %v2727_v14, %s2899_s18  ;;  %v905_v9 = vpop.f32.mrf.mxu0 }
 0x1ab   : > { %v1014_v16 = vpop.f32.mrf.mxu1 }
 0x1ac   : > { %1180 = vrot.lane.b32.xlu1 %v1014_v16, %s2899_s18  ;;  %v909_v38 = vpop.f32.mrf.mxu0 }
 0x1ad   : > { %v2730_v18 = vpop.f32.mrf.mxu1 }
 0x1ae   : > { %v911_v15 = vpop.f32.mrf.mxu0 }
 0x1af   : > { %v1024_v19 = vpop.f32.mrf.mxu1 }
 0x1b0   : > { %1233 = vrot.lane.b32.xlu1 %v2730_v18, %s2900_s19  ;;  %v915_v23 = vpop.f32.mrf.mxu0 }
 0x1b1   : > { %v2733_v24 = vpop.f32.mrf.mxu1 }
 0x1b2   : > { %1274 = vrot.lane.b32.xlu0 %v2733_v24, %s2901_s20  ;;  %v917_v39 = vpop.f32.mrf.mxu0  ;;  %v1123_v24 = vld [vmem:[%s3332_s29 + $0x8] sm:$0xff] }
 0x1b3   : > { %v1034_v26 = vpop.f32.mrf.mxu1 }
 0x1b4   : > { %1227 = vrot.lane.b32.xlu1 %v1024_v19, %s2900_s19  ;;  %v921_v40 = vpop.f32.mrf.mxu0 }
 0x1b5   : > { %v2736_v28 = vpop.f32.mrf.mxu1 }
 0x1b6   : > { %1176 = vrot.lane.b32.xlu0 %v867_v4, %s2899_s18  ;;  %v923_v21 = vpop.f32.mrf.mxu0  ;;  %v1117_v4 = vlaneseq }
 0x1b7   : > { %v1044_v31 = vpop.f32.mrf.mxu1 }
 0x1b8   : > { %1268 = vrot.lane.b32.xlu1 %v1034_v26, %s2901_s20  ;;  %v927_v22 = vpop.f32.mrf.mxu0 }
 0x1b9   : > { %v2739_v37 = vpop.f32.mrf.mxu1 }
 0x1ba   : > { %1178 = vrot.lane.b32.xlu0 %v869_v7, %s2899_s18  ;;  %v929_v34 = vpop.f32.mrf.mxu0 }
 0x1bb   : > { %v1054_v5 = vpop.f32.mrf.mxu1 }
 0x1bc   : > { %1317 = vrot.lane.b32.xlu1 %v2736_v28, %s2902_s21  ;;  %v933_v41 = vpop.f32.mrf.mxu0 }
 0x1bd   : > { %v2742_v6 = vpop.f32.mrf.mxu1 }
 0x1be   : > { %1223 = vrot.lane.b32.xlu0 %v879_v13, %s2900_s19  ;;  %v935_v42 = vpop.f32.mrf.mxu0 }
 0x1bf   : > { %v1064_v32 = vpop.f32.mrf.mxu1 }
 0x1c0   : > { %1182 = vrot.lane.b32.xlu1 %v873_v8, %s2899_s18 }
 0x1c2   : > { %1225 = vrot.lane.b32.xlu0 %v881_v17, %s2900_s19 }
 0x1c4   : > { %1311 = vrot.lane.b32.xlu1 %v1044_v31, %s2902_s21 }
 0x1c6   : > { %1231 = vrot.lane.b32.xlu0 %v887_v25, %s2900_s19 }
 0x1c8   : > { %1184 = vrot.lane.b32.xlu1 %v875_v10, %s2899_s18  ;;  %v1118_v10 = vand.u32 127, %v1117_v4 }
 0x1ca   : > { %1266 = vrot.lane.b32.xlu0 %v893_v29, %s2901_s20  ;;  %v1119_v13 = vadd.s32 128, %v1118_v10  ;;  %v3334_v17 = vand.u32 15, %v1118_v10 }
 0x1cc   : > { %1364 = vrot.lane.b32.xlu1 %v2739_v37, %s2903_s22  ;;  %v3336_v18 = vand.u32 15, %v1119_v13  ;;  %vm1144_vm9 = vcmp.ge.s32.totalorder %v3334_v17, 3  ;;  %vm3948_vm12 = vcmp.ge.s32.totalorder %v3334_v17, 2  ;;  %vm3947_vm14 = vcmp.ge.s32.totalorder %v3334_v17, 1 }
 0x1cd   : > { %v1150_v31 = vsel %vm1144_vm9, %v3240_v63, 0.0  ;;  %vm3952_vm2 = vcmp.lt.s32.totalorder %v3334_v17, 15  ;;  %vm3950_vm1 = vcmp.lt.s32.totalorder %v3334_v17, 14 }
 0x1ce   : > { %1307 = vrot.lane.b32.xlu0 %v903_v36, %s2902_s21  ;;  %vm1145_vm10 = vcmp.ge.s32.totalorder %v3336_v18, 3  ;;  %vm1165_vm13 = vcmp.ge.s32.totalorder %v3336_v18, 2  ;;  %vm1212_vm15 = vcmp.ge.s32.totalorder %v3336_v18, 1  ;;  %vm3945_vm4 = vcmp.lt.s32.totalorder %v3336_v18, 15 }
 0x1cf   : > { %vm3946_vm3 = vcmp.lt.s32.totalorder %v3336_v18, 14 }
 0x1d0   : > { %1358 = vrot.lane.b32.xlu1 %v1054_v5, %s2903_s22 }
 0x1d2   : > { %1309 = vrot.lane.b32.xlu0 %v905_v9, %s2902_s21 }
 0x1d4   : > { %1411 = vrot.lane.b32.xlu1 %v2742_v6, %s2904_s23 }
 0x1d6   : > { %1313 = vrot.lane.b32.xlu0 %v909_v38, %s2902_s21 }
 0x1d8   : > { %1229 = vrot.lane.b32.xlu1 %v885_v20, %s2900_s19  ;;  %v1122_v20 = vld [vmem:[%s3332_s29] sm:$0xff] }
 0x1d9   : > { %v1136_v26 = vadd.f32 %v1129_v35, %v1122_v20 }
 0x1da   : > { %1315 = vrot.lane.b32.xlu0 %v911_v15, %s2902_s21 }
 0x1dc   : > { %1264 = vrot.lane.b32.xlu1 %v891_v27, %s2901_s20  ;;  %v1137_v27 = vadd.f32 %v1129_v35, %v1123_v24 }
 0x1de   : > { %1354 = vrot.lane.b32.xlu0 %v915_v23, %s2903_s22 }
 0x1e0   : > { %1270 = vrot.lane.b32.xlu1 %v897_v30, %s2901_s20 }
 0x1e2   : > { %1356 = vrot.lane.b32.xlu0 %v917_v39, %s2903_s22 }
 0x1e4   : > { %1272 = vrot.lane.b32.xlu1 %v899_v33, %s2901_s20  ;;  %v1151_v33 = vsel %vm1145_vm10, %v3242_v1, 0.0  ;;  %v1154_v1 = vadd.f32 %v1150_v31, %v1136_v26  ;;  %v1153_v31 = vsel %vm1145_vm10, %v3246_v3, 0.0 }
 0x1e5   : > { %v1155_v6 = vadd.f32 %v1151_v33, %v1137_v27 }
 0x1e6   : > { %1362 = vrot.lane.b32.xlu0 %v923_v21, %s2903_s22 }
 0x1e8   : > { %1360 = vrot.lane.b32.xlu1 %v921_v40, %s2903_s22 }
 0x1ea   : > { %1403 = vrot.lane.b32.xlu0 %v929_v34, %s2904_s23 }
 0x1ec   : > { %1407 = vrot.lane.b32.xlu1 %v933_v41, %s2904_s23 }
 0x1ee   : > { %1409 = vrot.lane.b32.xlu0 %v935_v42, %s2904_s23 }
 0x1f0   : > { %1405 = vrot.lane.b32.xlu1 %v1064_v32, %s2904_s23 }
 0x1f2   : > { %1401 = vrot.lane.b32.xlu0 %v927_v22, %s2904_s23 }
 0x1f4   : > { %2853 = vrot.lane.b32.xlu1 %v2890_v0, %s2892_s8 }
 0x1f6   : > { %2848 = vrot.lane.b32.xlu0 %v2890_v0, %s2891_s26 }
 0x1f8   : > { %2868 = vrot.lane.b32.xlu1 %v2890_v0, %s2895_s11 }
 0x1fa   : > { %2858 = vrot.lane.b32.xlu0 %v2890_v0, %s2893_s9 }
 0x1fc   : > { %2878 = vrot.lane.b32.xlu1 %v2890_v0, %s2897_s13 }
 0x1fe   : > { %2863 = vrot.lane.b32.xlu0 %v2890_v0, %s2894_s10 }
 0x202   : > { %2873 = vrot.lane.b32.xlu0 %v2890_v0, %s2896_s12 }
 0x21c   : > { %v3300_v45 = vpop.permute.xlu0 %1186 }
 0x21e   : > { %v1181_v44 = vpop.permute.xlu1 %1180 }
 0x222   : > { %v3302_v46 = vpop.permute.xlu1 %1233 }
 0x224   : > { %v3304_v47 = vpop.permute.xlu0 %1274 }
 0x226   : > { %v1228_v48 = vpop.permute.xlu1 %1227 }
 0x228   : > { %v1177_v49 = vpop.permute.xlu0 %1176 }
 0x22a   : > { %v3306_v50 = vpop.permute.xlu1 %1268 }
 0x22c   : > { %v1179_v51 = vpop.permute.xlu0 %1178 }
 0x22d   : > { %v1189_v29 = vsel %vm1188_vm8, %v1177_v49, %v1179_v51  ;;  %v1190_v30 = vsel %vm1188_vm8, %v1179_v51, %v1181_v44 }
 0x22e   : > { %v3308_v52 = vpop.permute.xlu1 %1317  ;;  %v1197_v5 = vsel %vm3948_vm12, %v1189_v29, 0.0  ;;  %v1198_v63 = vsel %vm1165_vm13, %v1190_v30, 0.0 }
 0x22f   : > { %v1201_v40 = vadd.f32 %v1197_v5, %v1154_v1  ;;  %v1202_v21 = vadd.f32 %v1198_v63, %v1155_v6  ;;  %v1124_v5 = vld [vmem:[%s3332_s29 + $0x10] sm:$0xff] }
 0x230   : > { %v1224_v53 = vpop.permute.xlu0 %1223  ;;  %v1138_v6 = vadd.f32 %v3298_v43, %v1124_v5 }
 0x232   : > { %v3310_v54 = vpop.permute.xlu1 %1182 }
 0x234   : > { %v1226_v55 = vpop.permute.xlu0 %1225 }
 0x235   : > { %v1236_v37 = vsel %vm1235_vm11, %v1224_v53, %v1226_v55  ;;  %v1237_v9 = vsel %vm1235_vm11, %v1226_v55, %v1228_v48 }
 0x236   : > { %v1312_v56 = vpop.permute.xlu1 %1311  ;;  %v1244_v15 = vsel %vm3947_vm14, %v1236_v37, 0.0  ;;  %v1245_v23 = vsel %vm1212_vm15, %v1237_v9, 0.0 }
 0x237   : > { %v1249_v32 = vadd.f32 %v1245_v23, %v1202_v21  ;;  %v1248_v35 = vadd.f32 %v1244_v15, %v1201_v40  ;;  %v1152_v40 = vsel %vm1144_vm9, %v3244_v2, 0.0 }
 0x238   : > { %v3312_v57 = vpop.permute.xlu0 %1231 }
 0x239   : > { %v1239_v3 = vsel %vm1235_vm11, %v3312_v57, %v3302_v46 }
 0x23a   : > { %v3314_v58 = vpop.permute.xlu1 %1184 }
 0x23b   : > { %v1192_v27 = vsel %vm1188_vm8, %v3314_v58, %v3300_v45  ;;  %v1191_v15 = vsel %vm1188_vm8, %v3310_v54, %v3314_v58  ;;  %v1156_v58 = vadd.f32 %v1152_v40, %v1138_v6 }
 0x23c   : > { %v1267_v59 = vpop.permute.xlu0 %1266  ;;  %v1200_v63 = vsel %vm1165_vm13, %v1192_v27, 0.0  ;;  %v1199_v46 = vsel %vm3948_vm12, %v1191_v15, 0.0  ;;  %vm3954_vm12 = vcmp.lt.s32.totalorder %v3336_v18, 14 }
 0x23d   : > { %v1278_v34 = vsel %vm1276_vm6, %v1267_v59, %v3306_v50 }
 0x23e   : > { %v3316_v60 = vpop.permute.xlu1 %1364  ;;  %v1286_v50 = vadd.f32 %v1278_v34, %v1249_v32 }
 0x240   : > { %v3318_v61 = vpop.permute.xlu0 %1307 }
 0x242   : > { %v1359_v62 = vpop.permute.xlu1 %1358 }
 0x244   : > { %v1310_v7 = vpop.permute.xlu0 %1309 }
 0x245   : > { %v1321_v22 = vsel %vm1319_vm7, %v1310_v7, %v1312_v56  ;;  %v1320_v51 = vsel %vm1319_vm7, %v3318_v61, %v1310_v7 }
 0x246   : > { %v3320_v8 = vpop.permute.xlu1 %1411  ;;  %v1329_v48 = vsel %vm3945_vm4, %v1321_v22, 0.0  ;;  %v1328_v10 = vsel %vm3952_vm2, %v1320_v51, 0.0  ;;  %vm3951_vm4 = vcmp.lt.s32.totalorder %v3336_v18, 13 }
 0x247   : > { %v1333_v4 = vadd.f32 %v1329_v48, %v1286_v50 }
 0x248   : > { %v3322_v11 = vpop.permute.xlu0 %1313 }
 0x24a   : > { %v3324_v12 = vpop.permute.xlu1 %1229 }
 0x24b   : > { %v1238_v21 = vsel %vm1235_vm11, %v3324_v12, %v3312_v57  ;;  %v1203_v57 = vadd.f32 %v1199_v46, %v1156_v58 }
 0x24c   : > { %v3326_v14 = vpop.permute.xlu0 %1315  ;;  %v1246_v2 = vsel %vm3947_vm14, %v1238_v21, 0.0  ;;  %vm3953_vm14 = vcmp.lt.s32.totalorder %v3336_v18, 15 }
 0x24d   : > { %v1323_v12 = vsel %vm1319_vm7, %v3326_v14, %v3308_v52  ;;  %v1322_v52 = vsel %vm1319_vm7, %v3322_v11, %v3326_v14 }
 0x24e   : > { %v1265_v16 = vpop.permute.xlu1 %1264  ;;  %v1331_v32 = vsel %vm3953_vm14, %v1323_v12, 0.0  ;;  %v1330_v11 = vsel %vm3952_vm2, %v1322_v52, 0.0  ;;  %vm3956_vm14 = vcmask 678912  }
 0x24f   : > { %v1277_v41 = vsel %vm1276_vm6, %v1265_v16, %v1267_v59 }
 0x250   : > { %v1355_v19 = vpop.permute.xlu0 %1354  ;;  %v1285_v53 = vadd.f32 %v1277_v41, %v1248_v35  ;;  %v1250_v41 = vadd.f32 %v1246_v2, %v1203_v57 }
 0x252   : > { %v3340_v25 = vpop.permute.xlu1 %1270  ;;  %v1332_v20 = vadd.f32 %v1328_v10, %v1285_v53 }
 0x254   : > { %v1357_v28 = vpop.permute.xlu0 %1356 }
 0x255   : > { %v1368_v44 = vsel %vm1366_vm5, %v1357_v28, %v1359_v62  ;;  %v1367_v55 = vsel %vm1366_vm5, %v1355_v19, %v1357_v28  ;;  %v1125_v62 = vld [vmem:[%s3332_s29 + $0x18] sm:$0xff] }
 0x256   : > { %v3354_v36 = vpop.permute.xlu1 %1272  ;;  %v1376_v56 = vsel %vm3946_vm3, %v1368_v44, 0.0  ;;  %v1375_v13 = vsel %vm3950_vm1, %v1367_v55, 0.0  ;;  %v1139_v19 = vadd.f32 %v3298_v43, %v1125_v62  ;;  %vm3949_vm3 = vcmp.lt.s32.totalorder %v3334_v17, 13  ;;  %v2212_v62 = vld [vmem:[%s3935_s6] sm:$0xff] }
 0x257   : > { %v1380_v61 = vadd.f32 %v1376_v56, %v1333_v4  ;;  %v1379_v28 = vadd.f32 %v1375_v13, %v1332_v20  ;;  %v1247_v43 = vsel %vm1212_vm15, %v1239_v3, 0.0  ;;  %v1280_v54 = vsel %vm1276_vm6, %v3354_v36, %v3304_v47  ;;  %v2213_v4 = vld [vmem:[%s3935_s6 + $0x8] sm:$0xff] }
 0x258   : > { %v3364_v38 = vpop.permute.xlu0 %1362  ;;  %v1157_v1 = vadd.f32 %v1153_v31, %v1139_v19  ;;  %v1279_v47 = vsel %vm1276_vm6, %v3340_v25, %v3354_v36 }
 0x259   : > { %v1287_v35 = vadd.f32 %v1279_v47, %v1250_v41 }
 0x25a   : > { %v3370_v39 = vpop.permute.xlu1 %1360  ;;  %v1204_v23 = vadd.f32 %v1200_v63, %v1157_v1 }
 0x25b   : > { %v1369_v36 = vsel %vm1366_vm5, %v3370_v39, %v3364_v38  ;;  %v1334_v48 = vadd.f32 %v1330_v11, %v1287_v35 }
 0x25c   : > { %v1404_v42 = vpop.permute.xlu0 %1403  ;;  %v1251_v22 = vadd.f32 %v1247_v43, %v1204_v23  ;;  %v1377_v51 = vsel %vm3950_vm1, %v1369_v36, 0.0 }
 0x25d   : > { %v1381_v53 = vadd.f32 %v1377_v51, %v1334_v48 }
 0x25e   : > { %v3383_v49 = vpop.permute.xlu1 %1407  ;;  %v1288_v34 = vadd.f32 %v1280_v54, %v1251_v22 }
 0x260   : > { %v3390_v59 = vpop.permute.xlu0 %1409  ;;  %v1335_v44 = vadd.f32 %v1331_v32, %v1288_v34 }
 0x261   : > { %v1417_v25 = vsel %vm1413_vm0, %v3390_v59, %v3320_v8  ;;  %v1416_v50 = vsel %vm1413_vm0, %v3383_v49, %v3390_v59  ;;  %v3505_v59 = vld [vmem:[%s3934_s5] sm:$0xff] }
 0x262   : > { %v1406_v16 = vpop.permute.xlu1 %1405  ;;  %v1425_v14 = vsel %vm3951_vm4, %v1417_v25, 0.0  ;;  %v1424_v39 = vsel %vm3949_vm3, %v1416_v50, 0.0 }
 0x263   : > { %v1415_v7 = vsel %vm1413_vm0, %v1404_v42, %v1406_v16  ;;  %v1428_v55 = vadd.f32 %v1424_v39, %v1381_v53 }
 0x264   : > { %v1423_v24 = vsel %vm3951_vm4, %v1415_v7, 0.0  ;;  %v1402_v26 = vpop.permute.xlu0 %1401  ;;  %vm3972_vm4 = vcmask 154624  }
 0x265   : > { %v1427_v29 = vadd.f32 %v1423_v24, %v1380_v61  ;;  %v1414_v30 = vsel %vm1413_vm0, %v1402_v26, %v1404_v42  ;;  %v1370_v42 = vsel %vm1366_vm5, %v3364_v38, %v3316_v60  ;;  %v1432_v49 = vmax.f32 %v1428_v55, 0.0 }
 0x266   : > { %v1422_v33 = vsel %vm3949_vm3, %v1414_v30, 0.0  ;;  %v1378_v60 = vsel %vm3954_vm12, %v1370_v42, 0.0  ;;  %vm3955_vm12 = vcmask 916480   ;;  %v3552_v16 = vpop.permute.xlu1 %2853 }
 0x267   : > { %v3412_v37 = vmax.f32 %v1427_v29, 0.0  ;;  %v1426_v9 = vadd.f32 %v1422_v33, %v1379_v28  ;;  %v1382_v8 = vadd.f32 %v1378_v60, %v1335_v44  ;;  %2771 = vmatprep.mubr.msk.f32.mxu0 %vm3955_vm12, %v3505_v59  ;;  %vm3957_vm12 = vmmov %vm3956_vm14  ;;  %v2855_v43 = vunpack.i.l.bf16 %v3552_v16 }
 0x268   : > { %v3548_v10 = vpop.permute.xlu0 %2848  ;;  %vm3958_vm3 = vmmov %vm3957_vm12  ;;  %v2856_v22 = vunpack.i.h.bf16 %v3552_v16 }
 0x269   : > { %v1430_v45 = vmax.f32 %v1426_v9, 0.0  ;;  %1756 = vrot.lane.b32.xlu0 %v3412_v37, %s2891_s26  ;;  %v1429_v38 = vadd.f32 %v1425_v14, %v1382_v8  ;;  %v2851_v23 = vunpack.i.h.bf16 %v3548_v10  ;;  %vm3959_vm1 = vmmov %vm3958_vm3 }
 0x26a   : > { %v3556_v61 = vpop.permute.xlu1 %2868 }
 0x26b   : > { %1754 = vrot.lane.b32.xlu1 %v1430_v45, %s2891_s26  ;;  %v1433_v56 = vmax.f32 %v1429_v38, 0.0  ;;  %v2870_v38 = vunpack.i.l.bf16 %v3556_v61 }
 0x26c   : > { %v3550_v13 = vpop.permute.xlu0 %2858 }
 0x26d   : > { %1704 = vrot.lane.b32.xlu0 %v1430_v45, %s2892_s8  ;;  %v2860_v34 = vunpack.i.l.bf16 %v3550_v13  ;;  %v2861_v32 = vunpack.i.h.bf16 %v3550_v13 }
 0x26e   : > { %v3560_v19 = vpop.permute.xlu1 %2878 }
 0x26f   : > { %1706 = vrot.lane.b32.xlu1 %v3412_v37, %s2892_s8 }
 0x270   : > { %v3554_v20 = vpop.permute.xlu0 %2863 }
 0x271   : > { %1656 = vrot.lane.b32.xlu0 %v3412_v37, %s2893_s9  ;;  %v2865_v11 = vunpack.i.l.bf16 %v3554_v20  ;;  %v2866_v8 = vunpack.i.h.bf16 %v3554_v20 }
 0x273   : > { %1654 = vrot.lane.b32.xlu1 %v1430_v45, %s2893_s9 }
 0x274   : > { %v3558_v7 = vpop.permute.xlu0 %2873 }
 0x275   : > { %1608 = vrot.lane.b32.xlu0 %v3412_v37, %s2894_s10 }
 0x277   : > { %1606 = vrot.lane.b32.xlu1 %v1430_v45, %s2894_s10 }
 0x279   : > { %1556 = vrot.lane.b32.xlu0 %v1430_v45, %s2895_s11 }
 0x27b   : > { %1558 = vrot.lane.b32.xlu1 %v3412_v37, %s2895_s11 }
 0x27d   : > { %1508 = vrot.lane.b32.xlu0 %v3412_v37, %s2896_s12 }
 0x27f   : > { %1506 = vrot.lane.b32.xlu1 %v1430_v45, %s2896_s12 }
 0x281   : > { %1714 = vrot.lane.b32.xlu0 %v1433_v56, %s2892_s8 }
 0x283   : > { %1764 = vrot.lane.b32.xlu1 %v1433_v56, %s2891_s26 }
 0x285   : > { %1712 = vrot.lane.b32.xlu0 %v1432_v49, %s2892_s8 }
 0x287   : > { %1762 = vrot.lane.b32.xlu1 %v1432_v49, %s2891_s26 }
 0x289   : > { %1456 = vrot.lane.b32.xlu0 %v1430_v45, %s2897_s13  ;;  %v2850_v45 = vunpack.i.l.bf16 %v3548_v10 }
 0x28b   : > { %1664 = vrot.lane.b32.xlu1 %v1433_v56, %s2893_s9 }
 0x28d   : > { %1614 = vrot.lane.b32.xlu0 %v1432_v49, %s2894_s10 }
 0x28f   : > { %1662 = vrot.lane.b32.xlu1 %v1432_v49, %s2893_s9 }
 0x291   : > { %1566 = vrot.lane.b32.xlu0 %v1433_v56, %s2895_s11 }
 0x293   : > { %1616 = vrot.lane.b32.xlu1 %v1433_v56, %s2894_s10 }
 0x295   : > { %1514 = vrot.lane.b32.xlu0 %v1432_v49, %s2896_s12 }
 0x297   : > { %1564 = vrot.lane.b32.xlu1 %v1432_v49, %s2895_s11 }
 0x299   : > { %1466 = vrot.lane.b32.xlu0 %v1433_v56, %s2897_s13 }
 0x29b   : > { %1516 = vrot.lane.b32.xlu1 %v1433_v56, %s2896_s12 }
 0x29d   : > { %1768 = vrot.lane.b32.xlu0 %v2890_v0, %s2891_s26 }
 0x29f   : > { %1464 = vrot.lane.b32.xlu1 %v1432_v49, %s2897_s13 }
 0x2a1   : > { %1718 = vrot.lane.b32.xlu0 %v2890_v0, %s2892_s8 }
 0x2a3   : > { %1458 = vrot.lane.b32.xlu1 %v3412_v37, %s2897_s13 }
 0x2a5   : > { %1668 = vrot.lane.b32.xlu0 %v2890_v0, %s2893_s9 }
 0x2a7   : > { %1760 = vrot.lane.b32.xlu1 %v2890_v0, %s2891_s26 }
 0x2a9   : > { %1618 = vrot.lane.b32.xlu0 %v2890_v0, %s2894_s10 }
 0x2ab   : > { %1710 = vrot.lane.b32.xlu1 %v2890_v0, %s2892_s8 }
 0x2ad   : > { %1568 = vrot.lane.b32.xlu0 %v2890_v0, %s2895_s11 }
 0x2af   : > { %1660 = vrot.lane.b32.xlu1 %v2890_v0, %s2893_s9 }
 0x2b1   : > { %1518 = vrot.lane.b32.xlu0 %v2890_v0, %s2896_s12 }
 0x2b3   : > { %1610 = vrot.lane.b32.xlu1 %v2890_v0, %s2894_s10 }
 0x2b5   : > { %1468 = vrot.lane.b32.xlu0 %v2890_v0, %s2897_s13 }
 0x2b7   : > { %1560 = vrot.lane.b32.xlu1 %v2890_v0, %s2895_s11 }
 0x2b9   : > { %2220 = vperm.xlu0 %2845, %v2212_v62   ;;  %v2871_v62 = vunpack.i.h.bf16 %v3556_v61 }
 0x2bb   : > { %1510 = vrot.lane.b32.xlu1 %v2890_v0, %s2896_s12 }
 0x2bf   : > { %1460 = vrot.lane.b32.xlu1 %v2890_v0, %s2897_s13 }
 0x2c3   : > { %2225 = vperm.xlu1 %2846, %v2213_v4  }
 0x2db   : > { %v1757_v24 = vpop.permute.xlu0 %1756 }
 0x2dc   : > { %v1771_v54 = vsel %vm3958_vm3, %v1757_v24, %v2851_v23 }
 0x2dd   : > { %v1755_v26 = vpop.permute.xlu1 %1754 }
 0x2de   : > { %v1770_v58 = vsel %vm3959_vm1, %v1755_v26, %v1757_v24  ;;  %v2875_v24 = vunpack.i.l.bf16 %v3558_v7 }
 0x2df   : > { %v1705_v27 = vpop.permute.xlu0 %1704 }
 0x2e1   : > { %v1707_v28 = vpop.permute.xlu1 %1706 }
 0x2e3   : > { %v1657_v29 = vpop.permute.xlu0 %1656 }
 0x2e5   : > { %v1655_v30 = vpop.permute.xlu1 %1654 }
 0x2e7   : > { %v3562_v31 = vpop.permute.xlu0 %1608 }
 0x2e9   : > { %v1607_v33 = vpop.permute.xlu1 %1606 }
 0x2eb   : > { %v3564_v37 = vpop.permute.xlu0 %1556 }
 0x2ed   : > { %v3566_v9 = vpop.permute.xlu1 %1558 }
 0x2ef   : > { %v3568_v5 = vpop.permute.xlu0 %1508 }
 0x2f1   : > { %v3570_v63 = vpop.permute.xlu1 %1506 }
 0x2f3   : > { %v1715_v1 = vpop.permute.xlu0 %1714 }
 0x2f5   : > { %v1765_v6 = vpop.permute.xlu1 %1764 }
 0x2f6   : > { %v1774_v3 = vsel %vm3956_vm14, %v1765_v6, %v2850_v45  ;;  %vm3960_vm14 = vcmask 809984  }
 0x2f7   : > { %v1713_v15 = vpop.permute.xlu0 %1712  ;;  %1890 = vmatprep.subr.mxu1 %v1774_v3  ;;  %v1724_v57 = vsel %vm3960_vm14, %v1715_v1, %v2855_v43 }
 0x2f9   : > { %v1763_v40 = vpop.permute.xlu1 %1762 }
 0x2fa   : > { %v1773_v21 = vsel %vm3957_vm12, %v1763_v40, %v1765_v6  ;;  %vm3961_vm12 = vmmov %vm3960_vm14  ;;  %vm3964_vm14 = vcmask 941056  }
 0x2fb   : > { %v3579_v46 = vpop.permute.xlu0 %1456  ;;  %1891 = vmatpush1.msra.mxu1 %v1773_v21  ;;  %v1723_v12 = vsel %vm3961_vm12, %v1713_v15, %v1715_v1  ;;  %vm3962_vm3 = vmmov %vm3961_vm12  ;;  %v2881_v21 = vunpack.i.h.bf16 %v3560_v19 }
 0x2fc   : > { %1892 = vmatprep.subr.mxu1 %v1771_v54  ;;  %v1721_v41 = vsel %vm3962_vm3, %v1707_v28, %v2856_v22  ;;  %vm3963_vm1 = vmmov %vm3962_vm3 }
 0x2fd   : > { %v1665_v2 = vpop.permute.xlu1 %1664  ;;  %1893 = vmatpush1.msra.mxu1 %v1770_v58  ;;  %v1720_v42 = vsel %vm3963_vm1, %v1705_v27, %v1707_v28  ;;  %vm3965_vm12 = vmmov %vm3964_vm14  ;;  %v2876_v28 = vunpack.i.h.bf16 %v3558_v7 }
 0x2fe   : > { %1894 = vmatprep.subr.mxu1 %v1724_v57  ;;  %v1674_v35 = vsel %vm3964_vm14, %v1665_v2, %v2860_v34  ;;  %vm3966_vm3 = vmmov %vm3965_vm12  ;;  %vm3968_vm14 = vcmask 23552   ;;  %v3664_v57 = vld [vmem:[%s3934_s5 + $0x8] sm:$0xff] }
 0x2ff   : > { %v1615_v47 = vpop.permute.xlu0 %1614  ;;  %1895 = vmatpush1.msra.mxu1 %v1723_v12  ;;  %v1671_v60 = vsel %vm3966_vm3, %v1657_v29, %v2861_v32  ;;  %vm3967_vm1 = vmmov %vm3966_vm3 }
 0x300   : > { %1896 = vmatprep.subr.mxu1 %v1721_v41  ;;  %v1670_v36 = vsel %vm3967_vm1, %v1655_v30, %v1657_v29 }
 0x301   : > { %v1663_v52 = vpop.permute.xlu1 %1662  ;;  %1897 = vmatpush1.msra.mxu1 %v1720_v42 }
 0x302   : > { %v1673_v44 = vsel %vm3965_vm12, %v1663_v52, %v1665_v2  ;;  %1898 = vmatprep.subr.mxu1 %v1674_v35  ;;  %vm3969_vm12 = vmmov %vm3968_vm14  ;;  %v1792_v35 = vld [vmem:[%s3934_s5 + $0x20] sm:$0xff] }
 0x303   : > { %v3600_v25 = vpop.permute.xlu0 %1566  ;;  %1899 = vmatpush1.msra.mxu1 %v1673_v44  ;;  %v1623_v50 = vsel %vm3969_vm12, %v2865_v11, %v1615_v47  ;;  %vm3970_vm3 = vmmov %vm3969_vm12 }
 0x304   : > { %1900 = vmatprep.subr.mxu1 %v1671_v60  ;;  %v1621_v39 = vsel %vm3970_vm3, %v1607_v33, %v3562_v31  ;;  %vm3971_vm1 = vmmov %vm3970_vm3 }
 0x305   : > { %v3607_v14 = vpop.permute.xlu1 %1616  ;;  %1901 = vmatpush1.msra.mxu1 %v1670_v36  ;;  %v1620_v53 = vsel %vm3971_vm1, %v2866_v8, %v1607_v33  ;;  %vm3974_vm12 = vmmov %vm3972_vm4  ;;  %v2880_v33 = vunpack.i.l.bf16 %v3560_v19 }
 0x306   : > { %v1624_v48 = vsel %vm3968_vm14, %v1615_v47, %v3607_v14  ;;  %vm3973_vm14 = vmmov %vm3972_vm4  ;;  %v1571_v20 = vsel %vm3974_vm12, %v3564_v37, %v3566_v9  ;;  %vm3979_vm12 = vcmask 678912  }
 0x307   : > { %v1515_v51 = vpop.permute.xlu0 %1514  ;;  %1902 = vmatprep.subr.mxu1 %v1624_v48  ;;  %vm3975_vm3 = vmmov %vm3972_vm4  ;;  %v1794_v48 = vld [vmem:[%s3934_s5 + $0x30] sm:$0xff] }
 0x308   : > { %1903 = vmatpush1.msra.mxu1 %v1623_v50  ;;  %v1570_v26 = vsel %vm3975_vm3, %v2871_v62, %v3564_v37 }
 0x309   : > { %v1565_v55 = vpop.permute.xlu1 %1564  ;;  %1904 = vmatprep.subr.mxu1 %v1621_v39  ;;  %v1798_v39 = vld [vmem:[%s3934_s5 + $0x50] sm:$0xff] }
 0x30a   : > { %v1573_v56 = vsel %vm3972_vm4, %v2870_v38, %v1565_v55  ;;  %1905 = vmatpush1.msra.mxu1 %v1620_v53  ;;  %v1574_v49 = vsel %vm3973_vm14, %v1565_v55, %v3600_v25  ;;  %vm3976_vm4 = vcmask 285696   ;;  %v1797_v38 = vld [vmem:[%s3934_s5 + $0x48] sm:$0xff]  ;;  %v1799_v53 = vld [vmem:[%s3934_s5 + $0x58] sm:$0xff]  ;;  %v1800_v55 = vld [vmem:[%s3934_s5 + $0x60] sm:$0xff] }
 0x30b   : > { %v3621_v4 = vpop.permute.xlu0 %1466  ;;  %1906 = vmatprep.subr.mxu1 %v1574_v49  ;;  %vm3977_vm1 = vmmov %vm3976_vm4 }
 0x30c   : > { %1907 = vmatpush1.msra.mxu1 %v1573_v56  ;;  %v1523_v29 = vsel %vm3977_vm1, %v2875_v24, %v1515_v51  ;;  %vm3978_vm14 = vmmov %vm3977_vm1  ;;  %v1801_v56 = vld [vmem:[%s3934_s5 + $0x68] sm:$0xff] }
 0x30d   : > { %v3629_v27 = vpop.permute.xlu1 %1516  ;;  %1908 = vmatprep.subr.mxu1 %v1571_v20  ;;  %v1521_v37 = vsel %vm3978_vm14, %v3570_v63, %v3568_v5  ;;  %vm3980_vm3 = vmmov %vm3977_vm1 }
 0x30e   : > { %1909 = vmatpush1.msra.mxu1 %v1570_v26  ;;  %v1524_v61 = vsel %vm3976_vm4, %v1515_v51, %v3629_v27  ;;  %v1520_v6 = vsel %vm3980_vm3, %v2876_v28, %v3570_v63  ;;  %vm3981_vm4 = vcmask 416768   ;;  %vm3985_vm3 = vcmask 916480   ;;  %v1796_v51 = vld [vmem:[%s3934_s5 + $0x40] sm:$0xff] }
 0x30f   : > { %v1769_v30 = vpop.permute.xlu0 %1768  ;;  %1910 = vmatprep.subr.mxu1 %v1524_v61  ;;  %vm3982_vm1 = vmmov %vm3981_vm4 }
 0x310   : > { %1911 = vmatpush1.msra.mxu1 %v1523_v29  ;;  %v1775_v1 = vsel %vm3979_vm12, %v2850_v45, %v1769_v30  ;;  %vm3983_vm14 = vmmov %vm3982_vm1 }
 0x311   : > { %v1465_v3 = vpop.permute.xlu1 %1464  ;;  %1912 = vmatprep.subr.mxu1 %v1521_v37  ;;  %2743 = vmatprep.subr.mxu0 %v1775_v1  ;;  %vm3984_vm12 = vmmov %vm3982_vm1 }
 0x312   : > { %v1473_v7 = vsel %vm3981_vm4, %v2880_v33, %v1465_v3  ;;  %1913 = vmatpush1.msra.mxu1 %v1520_v6  ;;  %2744 = vmatpush3.msra.mxu0 %v1775_v1  ;;  %v1474_v15 = vsel %vm3982_vm1, %v1465_v3, %v3621_v4  ;;  %v1470_v45 = vsel %vm3984_vm12, %v2881_v21, %v3579_v46  ;;  %vm3986_vm4 = vcmask 678912  }
 0x313   : > { %v1719_v40 = vpop.permute.xlu0 %1718  ;;  %1914 = vmatprep.subr.mxu1 %v1474_v15  ;;  %vm3987_vm1 = vcmask 809984  }
 0x314   : > { %1915 = vmatpush1.msra.mxu1 %v1473_v7  ;;  %vm3989_vm12 = vmmov %vm3987_vm1 }
 0x315   : > { %v3648_v54 = vpop.permute.xlu1 %1458 }
 0x316   : > { %v1471_v63 = vsel %vm3983_vm14, %v3579_v46, %v3648_v54  ;;  %v1725_v46 = vsel %vm3987_vm1, %v2855_v43, %v1719_v40  ;;  %vm3988_vm14 = vmmov %vm3985_vm3 }
 0x317   : > { %v1669_v58 = vpop.permute.xlu0 %1668  ;;  %1916 = vmatprep.subr.mxu1 %v1471_v63 }
 0x318   : > { %1917 = vmatpush1.msra.mxu1 %v1470_v45 }
 0x319   : > { %v1761_v2 = vpop.permute.xlu1 %1760  ;;  %2604 = vmatmul.mubr.msk.f32.vlgmr.msra.gmra.mxu1 %vm3985_vm3, %v3505_v59  ;;  %vm3990_vm3 = vcmask 941056  }
 0x31a   : > { %v1772_v19 = vsel %vm3986_vm4, %v2851_v23, %v1761_v2  ;;  %1956 = vmatprep.mubr.f32.mxu1 %v2890_v0  ;;  %v1675_v10 = vsel %vm3990_vm3, %v2860_v34, %v1669_v58  ;;  %v1790_v23 = vld [vmem:[%s3934_s5 + $0x10] sm:$0xff]  ;;  %vm3991_vm4 = vmmov %vm3988_vm14  ;;  %v1791_v34 = vld [vmem:[%s3934_s5 + $0x18] sm:$0xff] }
 0x31b   : > { %v1619_v12 = vpop.permute.xlu0 %1618  ;;  %2745 = vmatprep.subr.mxu0 %v1772_v19  ;;  %vm3992_vm1 = vmmov %vm3990_vm3 }
 0x31c   : > { %2746 = vmatpush3.msra.mxu0 %v1772_v19 }
 0x31d   : > { %v1711_v47 = vpop.permute.xlu1 %1710  ;;  %2605 = vmatmul.mubr.msk.f32.gmra.mxu1 %vm3988_vm14, %v3664_v57  ;;  %2747 = vmatprep.subr.mxu0 %v1725_v46  ;;  %vm3993_vm14 = vcmask 23552  }
 0x31e   : > { %2748 = vmatpush3.msra.mxu0 %v1725_v46  ;;  %v1722_v59 = vsel %vm3989_vm12, %v2856_v22, %v1711_v47  ;;  %1962 = vmatprep.mubr.f32.mxu1 %v2890_v0  ;;  %v1625_v22 = vsel %vm3993_vm14, %v3607_v14, %v1619_v12  ;;  %vm3994_vm12 = vmmov %vm3991_vm4 }
 0x31f   : > { %2749 = vmatprep.subr.mxu0 %v1722_v59  ;;  %v1569_v43 = vpop.permute.xlu0 %1568  ;;  %vm3995_vm3 = vmmov %vm3993_vm14 }
 0x320   : > { %2750 = vmatpush3.msra.mxu0 %v1722_v59 }
 0x321   : > { %v1661_v41 = vpop.permute.xlu1 %1660  ;;  %2751 = vmatprep.subr.mxu0 %v1675_v10  ;;  %2606 = vmatmul.mubr.msk.f32.gmra.mxu1 %vm3991_vm4, %v1790_v23  ;;  %vm3996_vm4 = vcmask 154624  }
 0x322   : > { %2752 = vmatpush3.msra.mxu0 %v1675_v10  ;;  %v1672_v16 = vsel %vm3992_vm1, %v2861_v32, %v1661_v41  ;;  %1968 = vmatprep.mubr.f32.mxu1 %v2890_v0  ;;  %v1575_v52 = vsel %vm3996_vm4, %v3600_v25, %v1569_v43  ;;  %vm3997_vm1 = vmmov %vm3994_vm12  ;;  %v1793_v25 = vld [vmem:[%s3934_s5 + $0x28] sm:$0xff] }
 0x323   : > { %2753 = vmatprep.subr.mxu0 %v1672_v16  ;;  %v1519_v32 = vpop.permute.xlu0 %1518  ;;  %vm3998_vm14 = vmmov %vm3996_vm4 }
 0x324   : > { %2754 = vmatpush3.msra.mxu0 %v1672_v16 }
 0x325   : > { %v1611_v42 = vpop.permute.xlu1 %1610  ;;  %2755 = vmatprep.subr.mxu0 %v1625_v22  ;;  %2607 = vmatmul.mubr.msk.f32.gmra.mxu1 %vm3994_vm12, %v1791_v34  ;;  %vm3999_vm12 = vcmask 285696  }
 0x326   : > { %2756 = vmatpush3.msra.mxu0 %v1625_v22  ;;  %v1622_v13 = vsel %vm3995_vm3, %v3562_v31, %v1611_v42  ;;  %1974 = vmatprep.mubr.f32.mxu1 %v2890_v0  ;;  %v1525_v60 = vsel %vm3999_vm12, %v3629_v27, %v1519_v32  ;;  %vm4000_vm3 = vmmov %vm3997_vm1 }
 0x327   : > { %2757 = vmatprep.subr.mxu0 %v1622_v13  ;;  %v1469_v36 = vpop.permute.xlu0 %1468  ;;  %vm4001_vm4 = vmmov %vm3999_vm12 }
 0x328   : > { %2758 = vmatpush3.msra.mxu0 %v1622_v13 }
 0x329   : > { %v1561_v44 = vpop.permute.xlu1 %1560  ;;  %2759 = vmatprep.subr.mxu0 %v1575_v52  ;;  %2608 = vmatmul.mubr.msk.f32.gmra.mxu1 %vm3997_vm1, %v1792_v35  ;;  %vm4002_vm1 = vcmask 416768  }
 0x32a   : > { %2760 = vmatpush3.msra.mxu0 %v1575_v52  ;;  %v1572_v31 = vsel %vm3998_vm14, %v3566_v9, %v1561_v44  ;;  %1980 = vmatprep.mubr.f32.mxu1 %v2890_v0  ;;  %v1475_v14 = vsel %vm4002_vm1, %v3621_v4, %v1469_v36  ;;  %vm4003_vm14 = vmmov %vm4000_vm3 }
 0x32b   : > { %2761 = vmatprep.subr.mxu0 %v1572_v31  ;;  %vm4004_vm12 = vmmov %vm4002_vm1 }
 0x32c   : > { %2762 = vmatpush3.msra.mxu0 %v1572_v31  ;;  %vm4006_vm1 = vmmov %vm4000_vm3 }
 0x32d   : > { %v1511_v11 = vpop.permute.xlu1 %1510  ;;  %2763 = vmatprep.subr.mxu0 %v1525_v60  ;;  %2609 = vmatmul.mubr.msk.f32.gmra.mxu1 %vm4000_vm3, %v1793_v25  ;;  %vm4009_vm2 = vmmov %vm4006_vm1 }
 0x32e   : > { %2764 = vmatpush3.msra.mxu0 %v1525_v60  ;;  %v1522_v9 = vsel %vm4001_vm4, %v3568_v5, %v1511_v11  ;;  %1986 = vmatprep.mubr.f32.mxu1 %v2890_v0  ;;  %v1795_v5 = vld [vmem:[%s3934_s5 + $0x38] sm:$0xff]  ;;  %vm4005_vm4 = vmmov %vm4000_vm3 }
 0x32f   : > { %2765 = vmatprep.subr.mxu0 %v1522_v9 }
 0x330   : > { %2766 = vmatpush3.msra.mxu0 %v1522_v9 }
 0x331   : > { %v1461_v8 = vpop.permute.xlu1 %1460  ;;  %2767 = vmatprep.subr.mxu0 %v1475_v14  ;;  %2610 = vmatmul.mubr.msk.f32.gmra.mxu1 %vm4003_vm14, %v1794_v48  ;;  %vm4007_vm14 = vmmov %vm4006_vm1 }
 0x332   : > { %2768 = vmatpush3.msra.mxu0 %v1475_v14  ;;  %v1472_v50 = vsel %vm4004_vm12, %v3648_v54, %v1461_v8  ;;  %1992 = vmatprep.mubr.f32.mxu1 %v2890_v0  ;;  %vm4008_vm12 = vmmov %vm4006_vm1 }
 0x333   : > { %2769 = vmatprep.subr.mxu0 %v1472_v50 }
 0x334   : > { %2770 = vmatpush3.msra.mxu0 %v1472_v50 }
 0x335   : > { %2772 = vmatmul.mubr.msk.f32.vlgmr.msra.gmra.mxu0 %vm4000_vm3, %v3664_v57  ;;  %2611 = vmatmul.mubr.msk.f32.gmra.mxu1 %vm4005_vm4, %v1795_v5  ;;  %vm4010_vm3 = vmmov %vm4006_vm1 }
 0x336   : > { %2774 = vmatprep.mubr.msk.f32.mxu0 %vm4006_vm1, %v1790_v23  ;;  %1998 = vmatprep.mubr.f32.mxu1 %v2890_v0  ;;  %vm4011_vm4 = vmmov %vm4006_vm1 }
 0x339   : > { %2775 = vmatmul.mubr.msk.f32.gmra.mxu0 %vm4007_vm14, %v1791_v34  ;;  %2612 = vmatmul.mubr.msk.f32.gmra.mxu1 %vm4008_vm12, %v1796_v51  ;;  %vm4012_vm14 = vmmov %vm4006_vm1 }
 0x33a   : > { %2777 = vmatprep.mubr.msk.f32.mxu0 %vm4009_vm2, %v1792_v35  ;;  %2004 = vmatprep.mubr.f32.mxu1 %v2890_v0  ;;  %vm4013_vm2 = vmmov %vm4006_vm1  ;;  %v2221_v35 = vpop.permute.xlu0 %2220 }
 0x33b   : > { %vm4014_vm12 = vmmov %vm4006_vm1 }
 0x33d   : > { %2778 = vmatmul.mubr.msk.f32.gmra.mxu0 %vm4010_vm3, %v1793_v25  ;;  %2613 = vmatmul.mubr.msk.f32.gmra.mxu1 %vm4011_vm4, %v1797_v38  ;;  %vm4015_vm3 = vmmov %vm4006_vm1 }
 0x33e   : > { %2780 = vmatprep.mubr.msk.f32.mxu0 %vm4006_vm1, %v1794_v48  ;;  %2010 = vmatprep.mubr.f32.mxu1 %v2890_v0  ;;  %vm4016_vm4 = vmmov %vm4006_vm1  ;;  %v2226_v52 = vpop.permute.xlu1 %2225 }
 0x341   : > { %2781 = vmatmul.mubr.msk.f32.gmra.mxu0 %vm4012_vm14, %v1795_v5  ;;  %2614 = vmatmul.mubr.msk.f32.gmra.mxu1 %vm4013_vm2, %v1798_v39  ;;  %vm4017_vm14 = vmmov %vm4006_vm1 }
 0x342   : > { %2783 = vmatprep.mubr.msk.f32.mxu0 %vm4014_vm12, %v1796_v51  ;;  %2016 = vmatprep.mubr.f32.mxu1 %v2890_v0  ;;  %vm4018_vm2 = vmmov %vm4006_vm1 }
 0x343   : > { %vm4019_vm12 = vmmov %vm4006_vm1 }
 0x345   : > { %2784 = vmatmul.mubr.msk.f32.gmra.mxu0 %vm4015_vm3, %v1797_v38  ;;  %2615 = vmatmul.mubr.msk.f32.gmra.mxu1 %vm4016_vm4, %v1799_v53  ;;  %vm4020_vm3 = vmmov %vm4006_vm1 }
 0x346   : > { %2786 = vmatprep.mubr.msk.f32.mxu0 %vm4006_vm1, %v1798_v39  ;;  %2022 = vmatprep.mubr.f32.mxu1 %v2890_v0  ;;  %vm4021_vm4 = vmmov %vm4006_vm1  ;;  %vm4022_vm1 = vcmp.ge.s32.totalorder %v3334_v17, 2 }
 0x349   : > { %2787 = vmatmul.mubr.msk.f32.gmra.mxu0 %vm4017_vm14, %v1799_v53  ;;  %2616 = vmatmul.mubr.msk.f32.gmra.mxu1 %vm4018_vm2, %v1800_v55  ;;  %vm4023_vm14 = vcmp.lt.s32.totalorder %v3336_v18, 15  ;;  %vm4025_vm2 = vcmp.ge.s32.totalorder %v3334_v17, 1 }
 0x34a   : > { %2789 = vmatprep.mubr.msk.f32.mxu0 %vm4019_vm12, %v1800_v55  ;;  %2028 = vmatprep.mubr.f32.mxu1 %v2890_v0  ;;  %vm4032_vm12 = vmmov %vm4023_vm14 }
 0x34d   : > { %2790 = vmatmul.mubr.msk.f32.gmra.mxu0 %vm4020_vm3, %v1801_v56  ;;  %2617 = vmatmul.mubr.msk.f32.gmra.mxu1 %vm4021_vm4, %v1801_v56 }
 0x3d9   : > { %v3770_v49 = vpop.f32.mrf.mxu1 }
 0x3db   : > { %v3772_v62 = vpop.f32.mrf.mxu1 }
 0x3dd   : > { %v3774_v4 = vpop.f32.mrf.mxu1 }
 0x3df   : > { %v3776_v20 = vpop.f32.mrf.mxu1 }
 0x3e1   : > { %v1964_v24 = vpop.f32.mrf.mxu1 }
 0x3e3   : > { %v1966_v26 = vpop.f32.mrf.mxu1 }
 0x3e5   : > { %v1970_v27 = vpop.f32.mrf.mxu1 }
 0x3e7   : > { %v1972_v61 = vpop.f32.mrf.mxu1 }
 0x3e9   : > { %v1976_v28 = vpop.f32.mrf.mxu1 }
 0x3eb   : > { %v1978_v29 = vpop.f32.mrf.mxu1 }
 0x3ed   : > { %v1982_v33 = vpop.f32.mrf.mxu1 }
 0x3ef   : > { %v1984_v6 = vpop.f32.mrf.mxu1 }
 0x3f1   : > { %v1988_v15 = vpop.f32.mrf.mxu1 }
 0x3f3   : > { %v1990_v54 = vpop.f32.mrf.mxu1 }
 0x3f5   : > { %v2773_v30 = vpop.f32.mrf.mxu0  ;;  %v1994_v58 = vpop.f32.mrf.mxu1 }
 0x3f7   : > { %v2101_v0 = vpop.f32.mrf.mxu0  ;;  %v1996_v19 = vpop.f32.mrf.mxu1 }
 0x3f9   : > { %v2776_v37 = vpop.f32.mrf.mxu0  ;;  %v2000_v12 = vpop.f32.mrf.mxu1 }
 0x3fa   : > { %2266 = vrot.lane.b32.xlu1 %v2776_v37, %s2899_s18 }
 0x3fb   : > { %v2111_v1 = vpop.f32.mrf.mxu0  ;;  %v2002_v47 = vpop.f32.mrf.mxu1 }
 0x3fc   : > { %2260 = vrot.lane.b32.xlu0 %v2111_v1, %s2899_s18 }
 0x3fd   : > { %v2779_v3 = vpop.f32.mrf.mxu0  ;;  %v2006_v10 = vpop.f32.mrf.mxu1 }
 0x3fe   : > { %2306 = vrot.lane.b32.xlu1 %v2779_v3, %s2900_s19 }
 0x3ff   : > { %v2121_v7 = vpop.f32.mrf.mxu0  ;;  %v2008_v23 = vpop.f32.mrf.mxu1 }
 0x400   : > { %2300 = vrot.lane.b32.xlu0 %v2121_v7, %s2900_s19 }
 0x401   : > { %v2782_v40 = vpop.f32.mrf.mxu0  ;;  %v2012_v43 = vpop.f32.mrf.mxu1 }
 0x402   : > { %2346 = vrot.lane.b32.xlu1 %v2782_v40, %s2901_s20 }
 0x403   : > { %v2131_v21 = vpop.f32.mrf.mxu0  ;;  %v2014_v41 = vpop.f32.mrf.mxu1 }
 0x404   : > { %2340 = vrot.lane.b32.xlu0 %v2131_v21, %s2901_s20 }
 0x405   : > { %v2785_v63 = vpop.f32.mrf.mxu0  ;;  %v2018_v16 = vpop.f32.mrf.mxu1 }
 0x406   : > { %2382 = vrot.lane.b32.xlu1 %v2785_v63, %s2902_s21 }
 0x407   : > { %v2141_v45 = vpop.f32.mrf.mxu0  ;;  %v2020_v22 = vpop.f32.mrf.mxu1 }
 0x408   : > { %2376 = vrot.lane.b32.xlu0 %v2141_v45, %s2902_s21 }
 0x409   : > { %v2788_v2 = vpop.f32.mrf.mxu0  ;;  %v2024_v34 = vpop.f32.mrf.mxu1 }
 0x40a   : > { %2422 = vrot.lane.b32.xlu1 %v2788_v2, %s2903_s22 }
 0x40b   : > { %v2151_v57 = vpop.f32.mrf.mxu0  ;;  %v2026_v42 = vpop.f32.mrf.mxu1 }
 0x40c   : > { %2256 = vrot.lane.b32.xlu0 %v1964_v24, %s2899_s18 }
 0x40d   : > { %v2791_v46 = vpop.f32.mrf.mxu0  ;;  %v2030_v13 = vpop.f32.mrf.mxu1 }
 0x40e   : > { %2258 = vrot.lane.b32.xlu1 %v1966_v26, %s2899_s18 }
 0x40f   : > { %v2161_v59 = vpop.f32.mrf.mxu0  ;;  %v2032_v32 = vpop.f32.mrf.mxu1 }
 0x410   : > { %2416 = vrot.lane.b32.xlu0 %v2151_v57, %s2903_s22 }
 0x412   : > { %2262 = vrot.lane.b32.xlu1 %v1970_v27, %s2899_s18 }
 0x414   : > { %2264 = vrot.lane.b32.xlu0 %v1972_v61, %s2899_s18 }
 0x416   : > { %2298 = vrot.lane.b32.xlu1 %v1978_v29, %s2900_s19 }
 0x418   : > { %2456 = vrot.lane.b32.xlu0 %v2161_v59, %s2904_s23 }
 0x41a   : > { %2302 = vrot.lane.b32.xlu1 %v1982_v33, %s2900_s19  ;;  %v2237_v33 = vsel %vm1145_vm10, %v3772_v62, 0.0  ;;  %v2236_v62 = vsel %vm1144_vm9, %v3770_v49, 0.0 }
 0x41c   : > { %2296 = vrot.lane.b32.xlu0 %v1976_v28, %s2900_s19 }
 0x41e   : > { %2338 = vrot.lane.b32.xlu1 %v1990_v54, %s2901_s20 }
 0x420   : > { %2304 = vrot.lane.b32.xlu0 %v1984_v6, %s2900_s19 }
 0x422   : > { %2342 = vrot.lane.b32.xlu1 %v1994_v58, %s2901_s20 }
 0x424   : > { %2336 = vrot.lane.b32.xlu0 %v1988_v15, %s2901_s20 }
 0x426   : > { %2374 = vrot.lane.b32.xlu1 %v2002_v47, %s2902_s21 }
 0x428   : > { %2344 = vrot.lane.b32.xlu0 %v1996_v19, %s2901_s20  ;;  %s313_s20 = scalar_lea.vmem %s3931_s2, %s2956_s27 }
 0x429   : > { %v2215_v29 = vld [vmem:[%s313_s20 + $0x8] sm:$0xff]  ;;  %v2214_v3 = vld [vmem:[%s313_s20] sm:$0xff]  ;;  %v2216_v40 = vld [vmem:[%s313_s20 + $0x10] sm:$0xff] }
 0x42a   : > { %2378 = vrot.lane.b32.xlu1 %v2006_v10, %s2902_s21  ;;  %v2229_v1 = vadd.f32 %v2221_v35, %v2215_v29  ;;  %v2228_v58 = vadd.f32 %v2221_v35, %v2214_v3  ;;  %v2217_v2 = vld [vmem:[%s313_s20 + $0x18] sm:$0xff] }
 0x42c   : > { %2372 = vrot.lane.b32.xlu0 %v2000_v12, %s2902_s21  ;;  %v2241_v21 = vadd.f32 %v2237_v33, %v2229_v1  ;;  %v2230_v12 = vadd.f32 %v2226_v52, %v2216_v40 }
 0x42e   : > { %2414 = vrot.lane.b32.xlu1 %v2014_v41, %s2903_s22 }
 0x430   : > { %2380 = vrot.lane.b32.xlu0 %v2008_v23, %s2902_s21  ;;  %v2238_v23 = vsel %vm1144_vm9, %v3774_v4, 0.0  ;;  %vm4024_vm9 = vmmov %vm4022_vm1 }
 0x432   : > { %2418 = vrot.lane.b32.xlu1 %v2018_v16, %s2903_s22  ;;  %v2231_v16 = vadd.f32 %v2226_v52, %v2217_v2 }
 0x434   : > { %2412 = vrot.lane.b32.xlu0 %v2012_v43, %s2903_s22 }
 0x436   : > { %2454 = vrot.lane.b32.xlu1 %v2026_v42, %s2904_s23 }
 0x438   : > { %2420 = vrot.lane.b32.xlu0 %v2020_v22, %s2903_s22  ;;  %v2240_v22 = vadd.f32 %v2236_v62, %v2228_v58 }
 0x43a   : > { %2458 = vrot.lane.b32.xlu1 %v2030_v13, %s2904_s23 }
 0x43c   : > { %2452 = vrot.lane.b32.xlu0 %v2024_v34, %s2904_s23 }
 0x43e   : > { %2462 = vrot.lane.b32.xlu1 %v2791_v46, %s2904_s23 }
 0x440   : > { %2460 = vrot.lane.b32.xlu0 %v2032_v32, %s2904_s23  ;;  %v2239_v32 = vsel %vm1145_vm10, %v3776_v20, 0.0  ;;  %vm4027_vm10 = vmmov %vm4025_vm2  ;;  %s3887_s23 = scalar_lea.vmem %s3936_s7, %s2956_s27 }
 0x46c   : > { %v2267_v44 = vpop.permute.xlu1 %2266 }
 0x46e   : > { %v2261_v31 = vpop.permute.xlu0 %2260 }
 0x470   : > { %v3814_v60 = vpop.permute.xlu1 %2306 }
 0x472   : > { %v2301_v25 = vpop.permute.xlu0 %2300 }
 0x474   : > { %v3816_v36 = vpop.permute.xlu1 %2346 }
 0x476   : > { %v2341_v11 = vpop.permute.xlu0 %2340 }
 0x478   : > { %v3818_v9 = vpop.permute.xlu1 %2382 }
 0x47a   : > { %v2377_v14 = vpop.permute.xlu0 %2376 }
 0x47c   : > { %v3820_v48 = vpop.permute.xlu1 %2422 }
 0x47e   : > { %v2257_v8 = vpop.permute.xlu0 %2256 }
 0x480   : > { %v2259_v50 = vpop.permute.xlu1 %2258 }
 0x481   : > { %v2269_v0 = vsel %vm1188_vm8, %v2259_v50, %v2261_v31  ;;  %v2268_v54 = vsel %vm1188_vm8, %v2257_v8, %v2259_v50 }
 0x482   : > { %v2417_v5 = vpop.permute.xlu0 %2416  ;;  %v2277_v7 = vsel %vm1165_vm13, %v2269_v0, 0.0  ;;  %v2276_v43 = vsel %vm4022_vm1, %v2268_v54, 0.0 }
 0x483   : > { %v2281_v19 = vadd.f32 %v2277_v7, %v2241_v21  ;;  %v2280_v52 = vadd.f32 %v2276_v43, %v2240_v22 }
 0x484   : > { %v2263_v51 = vpop.permute.xlu1 %2262 }
 0x486   : > { %v2265_v38 = vpop.permute.xlu0 %2264 }
 0x487   : > { %v2270_v46 = vsel %vm1188_vm8, %v2263_v51, %v2265_v38  ;;  %v2271_v34 = vsel %vm1188_vm8, %v2265_v38, %v2267_v44  ;;  %vm4026_vm8 = vcmp.lt.s32.totalorder %v3336_v18, 14  ;;  %v2243_v51 = vadd.f32 %v2239_v32, %v2231_v16 }
 0x488   : > { %v2299_v39 = vpop.permute.xlu1 %2298  ;;  %v2278_v4 = vsel %vm4024_vm9, %v2270_v46, 0.0  ;;  %v2279_v8 = vsel %vm1165_vm13, %v2271_v34, 0.0  ;;  %vm4029_vm13 = vcmp.lt.s32.totalorder %v3336_v18, 13  ;;  %vm4034_vm3 = vmmov %vm4026_vm8 }
 0x489   : > { %v2309_v6 = vsel %vm1235_vm11, %v2299_v39, %v2301_v25  ;;  %v2242_v25 = vadd.f32 %v2238_v23, %v2230_v12  ;;  %vm4037_vm1 = vmmov %vm4029_vm13 }
 0x48a   : > { %v3822_v53 = vpop.permute.xlu0 %2456  ;;  %v2317_v63 = vsel %vm1212_vm15, %v2309_v6, 0.0  ;;  %v2283_v6 = vadd.f32 %v2279_v8, %v2243_v51 }
 0x48b   : > { %v2321_v41 = vadd.f32 %v2317_v63, %v2281_v19  ;;  %v2282_v38 = vadd.f32 %v2278_v4, %v2242_v25 }
 0x48c   : > { %v2303_v55 = vpop.permute.xlu1 %2302 }
 0x48e   : > { %v2297_v56 = vpop.permute.xlu0 %2296 }
 0x48f   : > { %v2308_v47 = vsel %vm1235_vm11, %v2297_v56, %v2299_v39 }
 0x490   : > { %v2339_v24 = vpop.permute.xlu1 %2338  ;;  %v2316_v35 = vsel %vm4025_vm2, %v2308_v47, 0.0 }
 0x491   : > { %v2349_v59 = vsel %vm1276_vm6, %v2339_v24, %v2341_v11  ;;  %v2320_v39 = vadd.f32 %v2316_v35, %v2280_v52 }
 0x492   : > { %v2305_v26 = vpop.permute.xlu0 %2304  ;;  %v2357_v31 = vadd.f32 %v2349_v59, %v2321_v41 }
 0x493   : > { %v2310_v11 = vsel %vm1235_vm11, %v2303_v55, %v2305_v26  ;;  %v2311_v20 = vsel %vm1235_vm11, %v2305_v26, %v3814_v60  ;;  %vm4028_vm11 = vcmp.lt.s32.totalorder %v3334_v17, 15 }
 0x494   : > { %v3824_v27 = vpop.permute.xlu1 %2342  ;;  %v2318_v29 = vsel %vm4027_vm10, %v2310_v11, 0.0  ;;  %v2319_v60 = vsel %vm1212_vm15, %v2311_v20, 0.0  ;;  %vm4030_vm15 = vcmp.lt.s32.totalorder %v3334_v17, 14 }
 0x496   : > { %v2337_v61 = vpop.permute.xlu0 %2336 }
 0x497   : > { %v2348_v56 = vsel %vm1276_vm6, %v2337_v61, %v2339_v24 }
 0x498   : > { %v2375_v28 = vpop.permute.xlu1 %2374 }
 0x499   : > { %v2385_v57 = vsel %vm1319_vm7, %v2375_v28, %v2377_v14 }
 0x49a   : > { %v3830_v30 = vpop.permute.xlu0 %2344  ;;  %v2393_v42 = vsel %vm4023_vm14, %v2385_v57, 0.0 }
 0x49b   : > { %v2397_v50 = vadd.f32 %v2393_v42, %v2357_v31  ;;  %v2350_v40 = vsel %vm1276_vm6, %v3824_v27, %v3830_v30  ;;  %v2351_v21 = vsel %vm1276_vm6, %v3830_v30, %v3816_v36  ;;  %vm4033_vm6 = vmmov %vm4030_vm15 }
 0x49c   : > { %v2379_v37 = vpop.permute.xlu1 %2378 }
 0x49e   : > { %v2373_v15 = vpop.permute.xlu0 %2372 }
 0x4a0   : > { %v2415_v45 = vpop.permute.xlu1 %2414 }
 0x4a1   : > { %v2425_v49 = vsel %vm1366_vm5, %v2415_v45, %v2417_v5  ;;  %v2384_v5 = vsel %vm1319_vm7, %v2373_v15, %v2375_v28  ;;  %v2356_v28 = vadd.f32 %v2348_v56, %v2320_v39  ;;  %v2322_v15 = vadd.f32 %v2318_v29, %v2282_v38 }
 0x4a2   : > { %v2381_v10 = vpop.permute.xlu0 %2380  ;;  %v2433_v44 = vsel %vm4026_vm8, %v2425_v49, 0.0  ;;  %v2392_v26 = vsel %vm4028_vm11, %v2384_v5, 0.0 }
 0x4a3   : > { %v2437_v0 = vadd.f32 %v2433_v44, %v2397_v50  ;;  %v2387_v3 = vsel %vm1319_vm7, %v2381_v10, %v3818_v9  ;;  %v2396_v58 = vadd.f32 %v2392_v26, %v2356_v28  ;;  %v2358_v30 = vadd.f32 %v2350_v40, %v2322_v15 }
 0x4a4   : > { %v2419_v13 = vpop.permute.xlu1 %2418  ;;  %v2395_v27 = vsel %vm4032_vm12, %v2387_v3, 0.0 }
 0x4a6   : > { %v2413_v14 = vpop.permute.xlu0 %2412 }
 0x4a7   : > { %v2424_v33 = vsel %vm1366_vm5, %v2413_v14, %v2415_v45  ;;  %v2323_v45 = vadd.f32 %v2319_v60, %v2283_v6 }
 0x4a8   : > { %v2455_v55 = vpop.permute.xlu1 %2454  ;;  %v2432_v54 = vsel %vm4030_vm15, %v2424_v33, 0.0 }
 0x4a9   : > { %v2465_v1 = vsel %vm1413_vm0, %v2455_v55, %v3822_v53  ;;  %v2386_v53 = vsel %vm1319_vm7, %v2379_v37, %v2381_v10  ;;  %vm4031_vm7 = vmmov %vm4028_vm11  ;;  %v2359_v62 = vadd.f32 %v2351_v21, %v2323_v45  ;;  %v2436_v19 = vadd.f32 %v2432_v54, %v2396_v58 }
 0x4aa   : > { %v2473_v24 = vsel %vm4029_vm13, %v2465_v1, 0.0  ;;  %v2421_v61 = vpop.permute.xlu0 %2420  ;;  %v2394_v2 = vsel %vm4031_vm7, %v2386_v53, 0.0 }
 0x4ab   : > { %v2477_v7 = vadd.f32 %v2473_v24, %v2437_v0  ;;  %v2426_v37 = vsel %vm1366_vm5, %v2419_v13, %v2421_v61  ;;  %v2427_v9 = vsel %vm1366_vm5, %v2421_v61, %v3820_v48  ;;  %vm4035_vm5 = vcmp.lt.s32.totalorder %v3334_v17, 13 }
 0x4ac   : > { %v2459_v63 = vpop.permute.xlu1 %2458  ;;  %v2434_v12 = vsel %vm4033_vm6, %v2426_v37, 0.0  ;;  %v2435_v46 = vsel %vm4034_vm3, %v2427_v9, 0.0  ;;  %v2398_v47 = vadd.f32 %v2394_v2, %v2358_v30  ;;  %v2399_v59 = vadd.f32 %v2395_v27, %v2359_v62  ;;  %vm4036_vm4 = vmmov %vm4035_vm5 }
 0x4ad   : > { %2481 = vst [vmem:[%s3887_s23 + $0x8] sm:$0xff] %v2477_v7 }
 0x4ae   : > { %v2453_v36 = vpop.permute.xlu0 %2452  ;;  %v2438_v41 = vadd.f32 %v2434_v12, %v2398_v47  ;;  %v2439_v49 = vadd.f32 %v2435_v46, %v2399_v59 }
 0x4af   : > { %v2464_v57 = vsel %vm1413_vm0, %v2453_v36, %v2455_v55 }
 0x4b0   : > { %v2472_v48 = vsel %vm4035_vm5, %v2464_v57, 0.0  ;;  %v2463_v23 = vpop.permute.xlu1 %2462 }
 0x4b1   : > { %v2476_v10 = vadd.f32 %v2472_v48, %v2436_v19 }
 0x4b2   : > { %v2461_v43 = vpop.permute.xlu0 %2460 }
 0x4b3   : > { %2480 = vst [vmem:[%s3887_s23] sm:$0xff] %v2476_v10  ;;  %v2466_v16 = vsel %vm1413_vm0, %v2459_v63, %v2461_v43  ;;  %v2467_v22 = vsel %vm1413_vm0, %v2461_v43, %v2463_v23 }
 0x4b4   : > { %v2474_v34 = vsel %vm4036_vm4, %v2466_v16, 0.0  ;;  %v2475_v42 = vsel %vm4037_vm1, %v2467_v22, 0.0 }
 0x4b5   : > { %v2478_v13 = vadd.f32 %v2474_v34, %v2438_v41  ;;  %v2479_v32 = vadd.f32 %v2475_v42, %v2439_v49 }
 0x4b7   : > { %2482 = vst [vmem:[%s3887_s23 + $0x10] sm:$0xff] %v2478_v13  ;;  %2483 = vst [vmem:[%s3887_s23 + $0x18] sm:$0xff] %v2479_v32 }
 0x4b8 PF: > { %s17_s24 = sadd.s32 1, %s2888_s24  }
 0x4b9   : > { %p14_p4 = scmp.ge.s32.totalorder %s17_s24, 4  }
 0x4bb   :  { %16 = sbr.rel (!%p14_p4) target bundleno = 1 (0x1), region = 84 }

</bundles_post_ra>
